<compile_context>
chip_gen: v7x
topology: tpu7x:2x2x1
jax: 0.10.0
libtpu: 0.0.40
codegen_flags: <defaults>
</compile_context>

<pallas_src>
import jax
import jax.numpy as jnp
import numpy as np
from jax.experimental import pallas as pl
from jax.experimental.pallas import tpu as pltpu

BATCH_PAD = 8      # pad batch to a full f32 sublane tile
HIDDEN_PAD = 128   # pad each gate's columns to a full lane tile
OUT_PAD = 128      # pad fc2 output columns so the final store is lane-dense


# ----------------------------------------------------------------------------
# Single fused kernel: LSTM recurrence (unrolled) + MLP head.
# ----------------------------------------------------------------------------
def fused_lstm_mlp_kernel(x_ref, wih_ref, whh_ref,
                          w1_hbm, b1_hbm, w2_hbm, b2_hbm, mask_hbm,
                          y_ref, c_out_ref,
                          xw_sc, w1_buf, b1_buf, w2_buf, b2_buf, mask_buf, sems):
    # ---- Kick off head-weight DMAs; they complete under the recurrence. ----
    head_copies = [
        pltpu.make_async_copy(w1_hbm, w1_buf, sems.at[0]),
        pltpu.make_async_copy(b1_hbm, b1_buf, sems.at[1]),
        pltpu.make_async_copy(w2_hbm, w2_buf, sems.at[2]),
        pltpu.make_async_copy(b2_hbm, b2_buf, sems.at[3]),
        pltpu.make_async_copy(mask_hbm, mask_buf, sems.at[4]),
    ]
    for cp in head_copies:
        cp.start()

    Bp, Hp = c_out_ref.shape           # (8, 128)                   — static
    H = whh_ref.shape[0]               # 64 true hidden (unpadded contraction)
    T = x_ref.shape[0] // Bp           # sequence length            — static

    # ---- Hoisted input projection: ONE matmul for ALL timesteps. -----------
    # Bias is already folded in: last row of wih_ref pairs with x's ones column.
    xw_sc[...] = jnp.dot(x_ref[...], wih_ref[...],
                         preferred_element_type=jnp.float32)      # (T*Bp, 4*Hp)

    h = jnp.zeros((Bp, Hp), jnp.float32)
    c = jnp.zeros((Bp, Hp), jnp.float32)

    # ---- Recurrence: T is small & static -> fully unrolled, static slices. --
    for t in range(T):
        gates = (xw_sc[t * Bp:(t + 1) * Bp, :]                    # aligned rows
                 + jnp.dot(h[:, :H], whh_ref[...],
                           preferred_element_type=jnp.float32))   # (Bp, 4*Hp)
        # Gate columns laid out [i | f | o | g], each 128 lanes wide:
        sig = jax.nn.sigmoid(gates[:, :3 * Hp])                   # i, f, o at once
        g_g = jnp.tanh(gates[:, 3 * Hp:])
        i_g = sig[:, 0 * Hp:1 * Hp]
        f_g = sig[:, 1 * Hp:2 * Hp]
        o_g = sig[:, 2 * Hp:3 * Hp]
        c = f_g * c + i_g * g_g         # padded lanes stay exactly 0 (zero cols)
        h = o_g * jnp.tanh(c)

    c_out_ref[...] = c                  # final CELL state (s_o[-1] == c_n)

    # ---- Fused MLP head: fc2(dropout(relu(fc1(c)))). ------------------------
    for cp in head_copies:              # DMAs have been in flight all along
        cp.wait()
    h1 = (jnp.dot(c[:, :H], w1_buf[...], preferred_element_type=jnp.float32)
          + b1_buf[...])
    h1 = jnp.maximum(h1, 0.0) * mask_buf[...]   # dropout p=0.5: mask in {0., 2.}
    y_ref[...] = (jnp.dot(h1, w2_buf[...], preferred_element_type=jnp.float32)
                  + b2_buf[...])                # (Bp, OUT_PAD), lane-dense store


_VMEM = pl.BlockSpec(memory_space=pltpu.MemorySpace.VMEM)
_HBM = pl.BlockSpec(memory_space=pl.ANY)   # raw HBM ref; DMA'd manually in-kernel


@jax.jit
def fused_forward(padded, x, drop_mask):
    """x: (B, T, I) batch-first.  drop_mask: (BATCH_PAD, 128) with values {0., 2.}.

    Returns (y, c_pad): y is (B,), c_pad is the padded final cell state."""
    B, T, I = x.shape
    Bp = drop_mask.shape[0]
    H, G = padded["w_hh"].shape
    Hp = G // 4
    OutP = padded["w2"].shape[1]

    x = x.astype(jnp.float32)
    # Time-major, batch padded to Bp sublanes, flattened to (T*Bp, I+1): each
    # timestep is then one contiguous, sublane-tile-aligned row slice in-kernel.
    x_tm = jnp.transpose(x, (1, 0, 2))                      # (T, B, I), tiny
    x_tm = jnp.pad(x_tm, ((0, 0), (0, Bp - B), (0, 0)))
    x_flat = x_tm.reshape(T * Bp, I)
    # Ones column folds the gate bias into the hoisted input projection.
    x_flat = jnp.concatenate([x_flat, jnp.ones((T * Bp, 1), jnp.float32)], axis=1)

    y_pad, c_pad = pl.pallas_call(
        fused_lstm_mlp_kernel,
        out_shape=(jax.ShapeDtypeStruct((Bp, OutP), jnp.float32),
                   jax.ShapeDtypeStruct((Bp, Hp), jnp.float32)),
        in_specs=[_VMEM, _VMEM, _VMEM,          # x, W_ih(+bias row), W_hh
                  _HBM, _HBM, _HBM, _HBM, _HBM],  # head weights + dropout mask
        out_specs=(_VMEM, _VMEM),
        scratch_shapes=[
            pltpu.VMEM((T * Bp, 4 * Hp), jnp.float32),        # hoisted x-projection
            pltpu.VMEM(padded["w1"].shape, jnp.float32),
            pltpu.VMEM(padded["b1"].shape, jnp.float32),
            pltpu.VMEM(padded["w2"].shape, jnp.float32),
            pltpu.VMEM(padded["b2"].shape, jnp.float32),
            pltpu.VMEM((Bp, 128), jnp.float32),               # dropout mask
            pltpu.SemaphoreType.DMA((5,)),
        ],
    )(x_flat, padded["w_ih"], padded["w_hh"],
      padded["w1"], padded["b1"], padded["w2"], padded["b2"], drop_mask)

    y = y_pad[:B, 0]              # column 0 of lane-padded fc2 out; torch.squeeze -> (B,)
    return y, c_pad


# ----------------------------------------------------------------------------
# Parameter init (PyTorch-style uniform init) + padding to the lane/gate-aligned
# layouts consumed by the kernel.
# ----------------------------------------------------------------------------
def init_params(key, input_size=11, hidden_size=64, output_size=1):
    ks = jax.random.split(key, 8)
    H, I = hidden_size, input_size
    k_lstm = 1.0 / np.sqrt(H)
    # nn.LSTM stores (4H, in); we keep transposed (in, 4H) for x @ W.
    w_ih_t = jax.random.uniform(ks[0], (I, 4 * H), jnp.float32, -k_lstm, k_lstm)
    w_hh_t = jax.random.uniform(ks[1], (H, 4 * H), jnp.float32, -k_lstm, k_lstm)
    b_ih = jax.random.uniform(ks[2], (4 * H,), jnp.float32, -k_lstm, k_lstm)
    b_hh = jax.random.uniform(ks[3], (4 * H,), jnp.float32, -k_lstm, k_lstm)
    b = (b_ih + b_hh).reshape(1, 4 * H)

    k1 = 1.0 / np.sqrt(H)
    w1 = jax.random.uniform(ks[4], (H, 128), jnp.float32, -k1, k1)
    b1 = jax.random.uniform(ks[5], (1, 128), jnp.float32, -k1, k1)
    k2 = 1.0 / np.sqrt(128.0)
    w2 = jax.random.uniform(ks[6], (128, output_size), jnp.float32, -k2, k2)
    b2 = jax.random.uniform(ks[7], (1, output_size), jnp.float32, -k2, k2)
    return dict(w_ih_t=w_ih_t, w_hh_t=w_hh_t, b=b, w1=w1, b1=b1, w2=w2, b2=b2)


def pad_params(p, input_size=11, hidden_size=64,
               hidden_pad=HIDDEN_PAD, out_pad=OUT_PAD):
    """Gate columns padded to 128 lanes (zero cols) and reordered [i,f,o,g];
    contraction dims are left UNPADDED (kernel slices h[:, :H] / c[:, :H]).
    If loading torch-exported weights, transpose weight_*_l0 to (in, 4H) first
    and feed them through this same function (gate order there is i,f,g,o)."""
    H, Hp = hidden_size, hidden_pad
    GATE_PERM = (0, 1, 3, 2)   # source order [i, f, g, o] -> layout [i, f, o, g]

    def pad_gate_cols(w):
        w = np.asarray(w, np.float32)                       # (rows, 4H)
        out = np.zeros((w.shape[0], 4 * Hp), np.float32)
        for dst, src in enumerate(GATE_PERM):
            out[:, dst * Hp:dst * Hp + H] = w[:, src * H:(src + 1) * H]
        return out

    # Fold the gate bias into an extra row of W_ih (matched by x's ones column).
    w_ih = np.concatenate([pad_gate_cols(p["w_ih_t"]),      # (I,  4*Hp)
                           pad_gate_cols(p["b"])], axis=0)  # (+1 bias row)
    w_hh = pad_gate_cols(p["w_hh_t"])                       # (H,  4*Hp) — no K pad

    w2 = np.zeros((128, out_pad), np.float32)
    w2[:, :np.asarray(p["w2"]).shape[1]] = np.asarray(p["w2"], np.float32)
    b2 = np.zeros((1, out_pad), np.float32)
    b2[:, :np.asarray(p["b2"]).shape[1]] = np.asarray(p["b2"], np.float32)

    return dict(
        w_ih=jnp.asarray(w_ih),                  # (I+1, 4*Hp)
        w_hh=jnp.asarray(w_hh),                  # (H,   4*Hp)
        w1=jnp.asarray(p["w1"], jnp.float32),    # (H, 128)
        b1=jnp.asarray(p["b1"], jnp.float32),    # (1, 128)
        w2=jnp.asarray(w2),                      # (128, OUT_PAD), col 0 is real
        b2=jnp.asarray(b2),                      # (1,   OUT_PAD)
    )


# ----------------------------------------------------------------------------
# Pure-JAX reference (sanity check only).
# ----------------------------------------------------------------------------
def lstm_ref(x_btI, w_ih_t, w_hh_t, b, H):
    B = x_btI.shape[0]
    x_tm = jnp.transpose(x_btI.astype(jnp.float32), (1, 0, 2))

    def step(carry, x_t):
        h, c = carry
        gates = x_t @ w_ih_t + h @ w_hh_t + b
        i = jax.nn.sigmoid(gates[:, 0 * H:1 * H])
        f = jax.nn.sigmoid(gates[:, 1 * H:2 * H])
        g = jnp.tanh(gates[:, 2 * H:3 * H])
        o = jax.nn.sigmoid(gates[:, 3 * H:4 * H])
        c = f * c + i * g
        h = o * jnp.tanh(c)
        return (h, c), None

    init = (jnp.zeros((B, H), jnp.float32), jnp.zeros((B, H), jnp.float32))
    (h, c), _ = jax.lax.scan(step, init, x_tm)
    return h, c


def model_ref(p, x, drop_mask, H):
    B = x.shape[0]
    _, c = lstm_ref(x, p["w_ih_t"], p["w_hh_t"], p["b"], H)
    a = jnp.maximum(c @ p["w1"] + p["b1"], 0.0) * drop_mask[:B, :]
    y = a @ p["w2"] + p["b2"]
    return jnp.squeeze(y), c


if __name__ == "__main__":
    B, T, I, H = 4, 8, 11, 64
    key = jax.random.PRNGKey(0)
    k_param, k_x, k_drop = jax.random.split(key, 3)

    raw = init_params(k_param, input_size=I, hidden_size=H, output_size=1)
    padded = pad_params(raw, input_size=I, hidden_size=H)

    x = jax.random.normal(k_x, (B, T, I), dtype=jnp.float32)

    # F.dropout default: p=0.5, training=True -> keep w.p. 0.5, survivors x2.
    # NOTE: regenerate this mask on every forward call (PyTorch draws a fresh one).
    # TODO(synk): PyTorch's exact dropout RNG stream is not reproduced (different PRNG).
    drop_mask = (jax.random.bernoulli(k_drop, 0.5, (BATCH_PAD, 128))
                 .astype(jnp.float32) * 2.0)

    y, c_pad = fused_forward(padded, x, drop_mask)
    y = jax.block_until_ready(y)

    # Cross-check against a pure-JAX reference (loose tolerances: MXU f32
    # matmul precision / accumulation order differs from plain XLA).
    y_ref, c_ref = model_ref(raw, x, drop_mask, H)
    np.testing.assert_allclose(np.asarray(c_pad[:B, :H]), np.asarray(c_ref),
                               atol=1e-2, rtol=1e-2)
    np.testing.assert_allclose(np.asarray(y), np.asarray(y_ref),
                               atol=2e-2, rtol=2e-2)

    assert y.shape == (B,) and y.dtype == jnp.float32
    print("KERNEL_OK")
</pallas_src>

<mosaic_0001>
module attributes {stable_mosaic.version = 11 : i64} {
  func.func @fused_lstm_mlp_kernel(%arg0: memref<64x12xf32, #tpu.memory_space<vmem>>, %arg1: memref<12x512xf32, #tpu.memory_space<vmem>>, %arg2: memref<64x512xf32, #tpu.memory_space<vmem>>, %arg3: memref<64x128xf32, #tpu.memory_space<any>>, %arg4: memref<1x128xf32, #tpu.memory_space<any>>, %arg5: memref<128x128xf32, #tpu.memory_space<any>>, %arg6: memref<1x128xf32, #tpu.memory_space<any>>, %arg7: memref<8x128xf32, #tpu.memory_space<any>>, %arg8: memref<8x128xf32, #tpu.memory_space<vmem>>, %arg9: memref<8x128xf32, #tpu.memory_space<vmem>>, %arg10: memref<64x512xf32, #tpu.memory_space<vmem>>, %arg11: memref<64x128xf32, #tpu.memory_space<vmem>>, %arg12: memref<1x128xf32, #tpu.memory_space<vmem>>, %arg13: memref<128x128xf32, #tpu.memory_space<vmem>>, %arg14: memref<1x128xf32, #tpu.memory_space<vmem>>, %arg15: memref<8x128xf32, #tpu.memory_space<vmem>>, %arg16: memref<5x!tpu.dma_semaphore, #tpu.memory_space<semaphore_mem>>) attributes {dimension_semantics = [], scalar_prefetch = 0 : i64, scratch_operands = 7 : i64, tpu.core_type = #tpu.core_type<tc>} {
    %c0_i32 = arith.constant 0 : i32
    %0 = tpu.memref_slice %arg16[%c0_i32] : memref<5x!tpu.dma_semaphore, #tpu.memory_space<semaphore_mem>> -> memref<1x!tpu.dma_semaphore, #tpu.memory_space<semaphore_mem>>
    %1 = tpu.memref_squeeze %0 : memref<1x!tpu.dma_semaphore, #tpu.memory_space<semaphore_mem>> -> memref<!tpu.dma_semaphore, #tpu.memory_space<semaphore_mem>>
    tpu.enqueue_dma source(%arg3 : memref<64x128xf32, #tpu.memory_space<any>>) target(%arg11 : memref<64x128xf32, #tpu.memory_space<vmem>>) target_semaphore(%1 : memref<!tpu.dma_semaphore, #tpu.memory_space<semaphore_mem>>)
    %c1_i32 = arith.constant 1 : i32
    %2 = tpu.memref_slice %arg16[%c1_i32] : memref<5x!tpu.dma_semaphore, #tpu.memory_space<semaphore_mem>> -> memref<1x!tpu.dma_semaphore, #tpu.memory_space<semaphore_mem>>
    %3 = tpu.memref_squeeze %2 : memref<1x!tpu.dma_semaphore, #tpu.memory_space<semaphore_mem>> -> memref<!tpu.dma_semaphore, #tpu.memory_space<semaphore_mem>>
    tpu.enqueue_dma source(%arg4 : memref<1x128xf32, #tpu.memory_space<any>>) target(%arg12 : memref<1x128xf32, #tpu.memory_space<vmem>>) target_semaphore(%3 : memref<!tpu.dma_semaphore, #tpu.memory_space<semaphore_mem>>)
    %c2_i32 = arith.constant 2 : i32
    %4 = tpu.memref_slice %arg16[%c2_i32] : memref<5x!tpu.dma_semaphore, #tpu.memory_space<semaphore_mem>> -> memref<1x!tpu.dma_semaphore, #tpu.memory_space<semaphore_mem>>
    %5 = tpu.memref_squeeze %4 : memref<1x!tpu.dma_semaphore, #tpu.memory_space<semaphore_mem>> -> memref<!tpu.dma_semaphore, #tpu.memory_space<semaphore_mem>>
    tpu.enqueue_dma source(%arg5 : memref<128x128xf32, #tpu.memory_space<any>>) target(%arg13 : memref<128x128xf32, #tpu.memory_space<vmem>>) target_semaphore(%5 : memref<!tpu.dma_semaphore, #tpu.memory_space<semaphore_mem>>)
    %c3_i32 = arith.constant 3 : i32
    %6 = tpu.memref_slice %arg16[%c3_i32] : memref<5x!tpu.dma_semaphore, #tpu.memory_space<semaphore_mem>> -> memref<1x!tpu.dma_semaphore, #tpu.memory_space<semaphore_mem>>
    %7 = tpu.memref_squeeze %6 : memref<1x!tpu.dma_semaphore, #tpu.memory_space<semaphore_mem>> -> memref<!tpu.dma_semaphore, #tpu.memory_space<semaphore_mem>>
    tpu.enqueue_dma source(%arg6 : memref<1x128xf32, #tpu.memory_space<any>>) target(%arg14 : memref<1x128xf32, #tpu.memory_space<vmem>>) target_semaphore(%7 : memref<!tpu.dma_semaphore, #tpu.memory_space<semaphore_mem>>)
    %c4_i32 = arith.constant 4 : i32
    %8 = tpu.memref_slice %arg16[%c4_i32] : memref<5x!tpu.dma_semaphore, #tpu.memory_space<semaphore_mem>> -> memref<1x!tpu.dma_semaphore, #tpu.memory_space<semaphore_mem>>
    %9 = tpu.memref_squeeze %8 : memref<1x!tpu.dma_semaphore, #tpu.memory_space<semaphore_mem>> -> memref<!tpu.dma_semaphore, #tpu.memory_space<semaphore_mem>>
    tpu.enqueue_dma source(%arg7 : memref<8x128xf32, #tpu.memory_space<any>>) target(%arg15 : memref<8x128xf32, #tpu.memory_space<vmem>>) target_semaphore(%9 : memref<!tpu.dma_semaphore, #tpu.memory_space<semaphore_mem>>)
    %c0 = arith.constant 0 : index
    %c0_0 = arith.constant 0 : index
    %10 = vector.load %arg0[%c0, %c0_0] : memref<64x12xf32, #tpu.memory_space<vmem>>, vector<64x12xf32>
    %c0_1 = arith.constant 0 : index
    %c0_2 = arith.constant 0 : index
    %11 = vector.load %arg1[%c0_1, %c0_2] : memref<12x512xf32, #tpu.memory_space<vmem>>, vector<12x512xf32>
    %cst = arith.constant dense<0.000000e+00> : vector<64x512xf32>
    %12 = tpu.matmul %10, %11, %cst {dimension_numbers = #tpu.dot_dimension_numbers<[1], [0], [0], [1], [0, 0, 1, 1], [], []>} : vector<64x12xf32>, vector<12x512xf32>, vector<64x512xf32> -> vector<64x512xf32>
    %c0_3 = arith.constant 0 : index
    %c0_4 = arith.constant 0 : index
    %13 = vector.load %arg10[%c0_3, %c0_4] : memref<64x512xf32, #tpu.memory_space<vmem>>, vector<64x512xf32>
    tpu.vector_store %arg10[%c0_3, %c0_4], %12 {strides = array<i32>} : memref<64x512xf32, #tpu.memory_space<vmem>>, vector<64x512xf32>,
    %cst_5 = arith.constant 0.000000e+00 : f32
    %14 = vector.broadcast %cst_5 : f32 to vector<8x128xf32>
    %cst_6 = arith.constant 0.000000e+00 : f32
    %15 = vector.broadcast %cst_6 : f32 to vector<8x128xf32>
    %c0_7 = arith.constant 0 : index
    %c0_8 = arith.constant 0 : index
    %16 = vector.load %arg10[%c0_7, %c0_8] : memref<64x512xf32, #tpu.memory_space<vmem>>, vector<8x512xf32>
    %17 = vector.extract_strided_slice %14 {offsets = [0, 0], sizes = [8, 64], strides = [1, 1]} : vector<8x128xf32> to vector<8x64xf32>
    %c0_9 = arith.constant 0 : index
    %c0_10 = arith.constant 0 : index
    %18 = vector.load %arg2[%c0_9, %c0_10] : memref<64x512xf32, #tpu.memory_space<vmem>>, vector<64x512xf32>
    %cst_11 = arith.constant dense<0.000000e+00> : vector<8x512xf32>
    %19 = tpu.matmul %17, %18, %cst_11 {dimension_numbers = #tpu.dot_dimension_numbers<[1], [0], [0], [1], [0, 0, 1, 1], [], []>} : vector<8x64xf32>, vector<64x512xf32>, vector<8x512xf32> -> vector<8x512xf32>
    %20 = arith.addf %16, %19 : vector<8x512xf32>
    %21 = vector.extract_strided_slice %20 {offsets = [0, 0], sizes = [8, 384], strides = [1, 1]} : vector<8x512xf32> to vector<8x384xf32>
    %22 = arith.negf %21 : vector<8x384xf32>
    %23 = math.exp %22 : vector<8x384xf32>
    %cst_12 = arith.constant 1.000000e+00 : f32
    %24 = vector.broadcast %cst_12 : f32 to vector<8x384xf32>
    %25 = arith.addf %24, %23 : vector<8x384xf32>
    %26 = arith.divf %24, %25 : vector<8x384xf32>
    %27 = vector.extract_strided_slice %20 {offsets = [0, 384], sizes = [8, 128], strides = [1, 1]} : vector<8x512xf32> to vector<8x128xf32>
    %28 = math.tanh %27 : vector<8x128xf32>
    %29 = vector.extract_strided_slice %26 {offsets = [0, 0], sizes = [8, 128], strides = [1, 1]} : vector<8x384xf32> to vector<8x128xf32>
    %30 = vector.extract_strided_slice %26 {offsets = [0, 128], sizes = [8, 128], strides = [1, 1]} : vector<8x384xf32> to vector<8x128xf32>
    %31 = vector.extract_strided_slice %26 {offsets = [0, 256], sizes = [8, 128], strides = [1, 1]} : vector<8x384xf32> to vector<8x128xf32>
    %32 = arith.mulf %30, %15 : vector<8x128xf32>
    %33 = arith.mulf %29, %28 : vector<8x128xf32>
    %34 = arith.addf %32, %33 : vector<8x128xf32>
    %35 = math.tanh %34 : vector<8x128xf32>
    %36 = arith.mulf %31, %35 : vector<8x128xf32>
    %c8 = arith.constant 8 : index
    %c0_13 = arith.constant 0 : index
    %37 = vector.load %arg10[%c8, %c0_13] : memref<64x512xf32, #tpu.memory_space<vmem>>, vector<8x512xf32>
    %38 = vector.extract_strided_slice %36 {offsets = [0, 0], sizes = [8, 64], strides = [1, 1]} : vector<8x128xf32> to vector<8x64xf32>
    %c0_14 = arith.constant 0 : index
    %c0_15 = arith.constant 0 : index
    %39 = vector.load %arg2[%c0_14, %c0_15] : memref<64x512xf32, #tpu.memory_space<vmem>>, vector<64x512xf32>
    %cst_16 = arith.constant dense<0.000000e+00> : vector<8x512xf32>
    %40 = tpu.matmul %38, %39, %cst_16 {dimension_numbers = #tpu.dot_dimension_numbers<[1], [0], [0], [1], [0, 0, 1, 1], [], []>} : vector<8x64xf32>, vector<64x512xf32>, vector<8x512xf32> -> vector<8x512xf32>
    %41 = arith.addf %37, %40 : vector<8x512xf32>
    %42 = vector.extract_strided_slice %41 {offsets = [0, 0], sizes = [8, 384], strides = [1, 1]} : vector<8x512xf32> to vector<8x384xf32>
    %43 = arith.negf %42 : vector<8x384xf32>
    %44 = math.exp %43 : vector<8x384xf32>
    %cst_17 = arith.constant 1.000000e+00 : f32
    %45 = vector.broadcast %cst_17 : f32 to vector<8x384xf32>
    %46 = arith.addf %45, %44 : vector<8x384xf32>
    %47 = arith.divf %45, %46 : vector<8x384xf32>
    %48 = vector.extract_strided_slice %41 {offsets = [0, 384], sizes = [8, 128], strides = [1, 1]} : vector<8x512xf32> to vector<8x128xf32>
    %49 = math.tanh %48 : vector<8x128xf32>
    %50 = vector.extract_strided_slice %47 {offsets = [0, 0], sizes = [8, 128], strides = [1, 1]} : vector<8x384xf32> to vector<8x128xf32>
    %51 = vector.extract_strided_slice %47 {offsets = [0, 128], sizes = [8, 128], strides = [1, 1]} : vector<8x384xf32> to vector<8x128xf32>
    %52 = vector.extract_strided_slice %47 {offsets = [0, 256], sizes = [8, 128], strides = [1, 1]} : vector<8x384xf32> to vector<8x128xf32>
    %53 = arith.mulf %51, %34 : vector<8x128xf32>
    %54 = arith.mulf %50, %49 : vector<8x128xf32>
    %55 = arith.addf %53, %54 : vector<8x128xf32>
    %56 = math.tanh %55 : vector<8x128xf32>
    %57 = arith.mulf %52, %56 : vector<8x128xf32>
    %c16 = arith.constant 16 : index
    %c0_18 = arith.constant 0 : index
    %58 = vector.load %arg10[%c16, %c0_18] : memref<64x512xf32, #tpu.memory_space<vmem>>, vector<8x512xf32>
    %59 = vector.extract_strided_slice %57 {offsets = [0, 0], sizes = [8, 64], strides = [1, 1]} : vector<8x128xf32> to vector<8x64xf32>
    %c0_19 = arith.constant 0 : index
    %c0_20 = arith.constant 0 : index
    %60 = vector.load %arg2[%c0_19, %c0_20] : memref<64x512xf32, #tpu.memory_space<vmem>>, vector<64x512xf32>
    %cst_21 = arith.constant dense<0.000000e+00> : vector<8x512xf32>
    %61 = tpu.matmul %59, %60, %cst_21 {dimension_numbers = #tpu.dot_dimension_numbers<[1], [0], [0], [1], [0, 0, 1, 1], [], []>} : vector<8x64xf32>, vector<64x512xf32>, vector<8x512xf32> -> vector<8x512xf32>
    %62 = arith.addf %58, %61 : vector<8x512xf32>
    %63 = vector.extract_strided_slice %62 {offsets = [0, 0], sizes = [8, 384], strides = [1, 1]} : vector<8x512xf32> to vector<8x384xf32>
    %64 = arith.negf %63 : vector<8x384xf32>
    %65 = math.exp %64 : vector<8x384xf32>
    %cst_22 = arith.constant 1.000000e+00 : f32
    %66 = vector.broadcast %cst_22 : f32 to vector<8x384xf32>
    %67 = arith.addf %66, %65 : vector<8x384xf32>
    %68 = arith.divf %66, %67 : vector<8x384xf32>
    %69 = vector.extract_strided_slice %62 {offsets = [0, 384], sizes = [8, 128], strides = [1, 1]} : vector<8x512xf32> to vector<8x128xf32>
    %70 = math.tanh %69 : vector<8x128xf32>
    %71 = vector.extract_strided_slice %68 {offsets = [0, 0], sizes = [8, 128], strides = [1, 1]} : vector<8x384xf32> to vector<8x128xf32>
    %72 = vector.extract_strided_slice %68 {offsets = [0, 128], sizes = [8, 128], strides = [1, 1]} : vector<8x384xf32> to vector<8x128xf32>
    %73 = vector.extract_strided_slice %68 {offsets = [0, 256], sizes = [8, 128], strides = [1, 1]} : vector<8x384xf32> to vector<8x128xf32>
    %74 = arith.mulf %72, %55 : vector<8x128xf32>
    %75 = arith.mulf %71, %70 : vector<8x128xf32>
    %76 = arith.addf %74, %75 : vector<8x128xf32>
    %77 = math.tanh %76 : vector<8x128xf32>
    %78 = arith.mulf %73, %77 : vector<8x128xf32>
    %c24 = arith.constant 24 : index
    %c0_23 = arith.constant 0 : index
    %79 = vector.load %arg10[%c24, %c0_23] : memref<64x512xf32, #tpu.memory_space<vmem>>, vector<8x512xf32>
    %80 = vector.extract_strided_slice %78 {offsets = [0, 0], sizes = [8, 64], strides = [1, 1]} : vector<8x128xf32> to vector<8x64xf32>
    %c0_24 = arith.constant 0 : index
    %c0_25 = arith.constant 0 : index
    %81 = vector.load %arg2[%c0_24, %c0_25] : memref<64x512xf32, #tpu.memory_space<vmem>>, vector<64x512xf32>
    %cst_26 = arith.constant dense<0.000000e+00> : vector<8x512xf32>
    %82 = tpu.matmul %80, %81, %cst_26 {dimension_numbers = #tpu.dot_dimension_numbers<[1], [0], [0], [1], [0, 0, 1, 1], [], []>} : vector<8x64xf32>, vector<64x512xf32>, vector<8x512xf32> -> vector<8x512xf32>
    %83 = arith.addf %79, %82 : vector<8x512xf32>
    %84 = vector.extract_strided_slice %83 {offsets = [0, 0], sizes = [8, 384], strides = [1, 1]} : vector<8x512xf32> to vector<8x384xf32>
    %85 = arith.negf %84 : vector<8x384xf32>
    %86 = math.exp %85 : vector<8x384xf32>
    %cst_27 = arith.constant 1.000000e+00 : f32
    %87 = vector.broadcast %cst_27 : f32 to vector<8x384xf32>
    %88 = arith.addf %87, %86 : vector<8x384xf32>
    %89 = arith.divf %87, %88 : vector<8x384xf32>
    %90 = vector.extract_strided_slice %83 {offsets = [0, 384], sizes = [8, 128], strides = [1, 1]} : vector<8x512xf32> to vector<8x128xf32>
    %91 = math.tanh %90 : vector<8x128xf32>
    %92 = vector.extract_strided_slice %89 {offsets = [0, 0], sizes = [8, 128], strides = [1, 1]} : vector<8x384xf32> to vector<8x128xf32>
    %93 = vector.extract_strided_slice %89 {offsets = [0, 128], sizes = [8, 128], strides = [1, 1]} : vector<8x384xf32> to vector<8x128xf32>
    %94 = vector.extract_strided_slice %89 {offsets = [0, 256], sizes = [8, 128], strides = [1, 1]} : vector<8x384xf32> to vector<8x128xf32>
    %95 = arith.mulf %93, %76 : vector<8x128xf32>
    %96 = arith.mulf %92, %91 : vector<8x128xf32>
    %97 = arith.addf %95, %96 : vector<8x128xf32>
    %98 = math.tanh %97 : vector<8x128xf32>
    %99 = arith.mulf %94, %98 : vector<8x128xf32>
    %c32 = arith.constant 32 : index
    %c0_28 = arith.constant 0 : index
    %100 = vector.load %arg10[%c32, %c0_28] : memref<64x512xf32, #tpu.memory_space<vmem>>, vector<8x512xf32>
    %101 = vector.extract_strided_slice %99 {offsets = [0, 0], sizes = [8, 64], strides = [1, 1]} : vector<8x128xf32> to vector<8x64xf32>
    %c0_29 = arith.constant 0 : index
    %c0_30 = arith.constant 0 : index
    %102 = vector.load %arg2[%c0_29, %c0_30] : memref<64x512xf32, #tpu.memory_space<vmem>>, vector<64x512xf32>
    %cst_31 = arith.constant dense<0.000000e+00> : vector<8x512xf32>
    %103 = tpu.matmul %101, %102, %cst_31 {dimension_numbers = #tpu.dot_dimension_numbers<[1], [0], [0], [1], [0, 0, 1, 1], [], []>} : vector<8x64xf32>, vector<64x512xf32>, vector<8x512xf32> -> vector<8x512xf32>
    %104 = arith.addf %100, %103 : vector<8x512xf32>
    %105 = vector.extract_strided_slice %104 {offsets = [0, 0], sizes = [8, 384], strides = [1, 1]} : vector<8x512xf32> to vector<8x384xf32>
    %106 = arith.negf %105 : vector<8x384xf32>
    %107 = math.exp %106 : vector<8x384xf32>
    %cst_32 = arith.constant 1.000000e+00 : f32
    %108 = vector.broadcast %cst_32 : f32 to vector<8x384xf32>
    %109 = arith.addf %108, %107 : vector<8x384xf32>
    %110 = arith.divf %108, %109 : vector<8x384xf32>
    %111 = vector.extract_strided_slice %104 {offsets = [0, 384], sizes = [8, 128], strides = [1, 1]} : vector<8x512xf32> to vector<8x128xf32>
    %112 = math.tanh %111 : vector<8x128xf32>
    %113 = vector.extract_strided_slice %110 {offsets = [0, 0], sizes = [8, 128], strides = [1, 1]} : vector<8x384xf32> to vector<8x128xf32>
    %114 = vector.extract_strided_slice %110 {offsets = [0, 128], sizes = [8, 128], strides = [1, 1]} : vector<8x384xf32> to vector<8x128xf32>
    %115 = vector.extract_strided_slice %110 {offsets = [0, 256], sizes = [8, 128], strides = [1, 1]} : vector<8x384xf32> to vector<8x128xf32>
    %116 = arith.mulf %114, %97 : vector<8x128xf32>
    %117 = arith.mulf %113, %112 : vector<8x128xf32>
    %118 = arith.addf %116, %117 : vector<8x128xf32>
    %119 = math.tanh %118 : vector<8x128xf32>
    %120 = arith.mulf %115, %119 : vector<8x128xf32>
    %c40 = arith.constant 40 : index
    %c0_33 = arith.constant 0 : index
    %121 = vector.load %arg10[%c40, %c0_33] : memref<64x512xf32, #tpu.memory_space<vmem>>, vector<8x512xf32>
    %122 = vector.extract_strided_slice %120 {offsets = [0, 0], sizes = [8, 64], strides = [1, 1]} : vector<8x128xf32> to vector<8x64xf32>
    %c0_34 = arith.constant 0 : index
    %c0_35 = arith.constant 0 : index
    %123 = vector.load %arg2[%c0_34, %c0_35] : memref<64x512xf32, #tpu.memory_space<vmem>>, vector<64x512xf32>
    %cst_36 = arith.constant dense<0.000000e+00> : vector<8x512xf32>
    %124 = tpu.matmul %122, %123, %cst_36 {dimension_numbers = #tpu.dot_dimension_numbers<[1], [0], [0], [1], [0, 0, 1, 1], [], []>} : vector<8x64xf32>, vector<64x512xf32>, vector<8x512xf32> -> vector<8x512xf32>
    %125 = arith.addf %121, %124 : vector<8x512xf32>
    %126 = vector.extract_strided_slice %125 {offsets = [0, 0], sizes = [8, 384], strides = [1, 1]} : vector<8x512xf32> to vector<8x384xf32>
    %127 = arith.negf %126 : vector<8x384xf32>
    %128 = math.exp %127 : vector<8x384xf32>
    %cst_37 = arith.constant 1.000000e+00 : f32
    %129 = vector.broadcast %cst_37 : f32 to vector<8x384xf32>
    %130 = arith.addf %129, %128 : vector<8x384xf32>
    %131 = arith.divf %129, %130 : vector<8x384xf32>
    %132 = vector.extract_strided_slice %125 {offsets = [0, 384], sizes = [8, 128], strides = [1, 1]} : vector<8x512xf32> to vector<8x128xf32>
    %133 = math.tanh %132 : vector<8x128xf32>
    %134 = vector.extract_strided_slice %131 {offsets = [0, 0], sizes = [8, 128], strides = [1, 1]} : vector<8x384xf32> to vector<8x128xf32>
    %135 = vector.extract_strided_slice %131 {offsets = [0, 128], sizes = [8, 128], strides = [1, 1]} : vector<8x384xf32> to vector<8x128xf32>
    %136 = vector.extract_strided_slice %131 {offsets = [0, 256], sizes = [8, 128], strides = [1, 1]} : vector<8x384xf32> to vector<8x128xf32>
    %137 = arith.mulf %135, %118 : vector<8x128xf32>
    %138 = arith.mulf %134, %133 : vector<8x128xf32>
    %139 = arith.addf %137, %138 : vector<8x128xf32>
    %140 = math.tanh %139 : vector<8x128xf32>
    %141 = arith.mulf %136, %140 : vector<8x128xf32>
    %c48 = arith.constant 48 : index
    %c0_38 = arith.constant 0 : index
    %142 = vector.load %arg10[%c48, %c0_38] : memref<64x512xf32, #tpu.memory_space<vmem>>, vector<8x512xf32>
    %143 = vector.extract_strided_slice %141 {offsets = [0, 0], sizes = [8, 64], strides = [1, 1]} : vector<8x128xf32> to vector<8x64xf32>
    %c0_39 = arith.constant 0 : index
    %c0_40 = arith.constant 0 : index
    %144 = vector.load %arg2[%c0_39, %c0_40] : memref<64x512xf32, #tpu.memory_space<vmem>>, vector<64x512xf32>
    %cst_41 = arith.constant dense<0.000000e+00> : vector<8x512xf32>
    %145 = tpu.matmul %143, %144, %cst_41 {dimension_numbers = #tpu.dot_dimension_numbers<[1], [0], [0], [1], [0, 0, 1, 1], [], []>} : vector<8x64xf32>, vector<64x512xf32>, vector<8x512xf32> -> vector<8x512xf32>
    %146 = arith.addf %142, %145 : vector<8x512xf32>
    %147 = vector.extract_strided_slice %146 {offsets = [0, 0], sizes = [8, 384], strides = [1, 1]} : vector<8x512xf32> to vector<8x384xf32>
    %148 = arith.negf %147 : vector<8x384xf32>
    %149 = math.exp %148 : vector<8x384xf32>
    %cst_42 = arith.constant 1.000000e+00 : f32
    %150 = vector.broadcast %cst_42 : f32 to vector<8x384xf32>
    %151 = arith.addf %150, %149 : vector<8x384xf32>
    %152 = arith.divf %150, %151 : vector<8x384xf32>
    %153 = vector.extract_strided_slice %146 {offsets = [0, 384], sizes = [8, 128], strides = [1, 1]} : vector<8x512xf32> to vector<8x128xf32>
    %154 = math.tanh %153 : vector<8x128xf32>
    %155 = vector.extract_strided_slice %152 {offsets = [0, 0], sizes = [8, 128], strides = [1, 1]} : vector<8x384xf32> to vector<8x128xf32>
    %156 = vector.extract_strided_slice %152 {offsets = [0, 128], sizes = [8, 128], strides = [1, 1]} : vector<8x384xf32> to vector<8x128xf32>
    %157 = vector.extract_strided_slice %152 {offsets = [0, 256], sizes = [8, 128], strides = [1, 1]} : vector<8x384xf32> to vector<8x128xf32>
    %158 = arith.mulf %156, %139 : vector<8x128xf32>
    %159 = arith.mulf %155, %154 : vector<8x128xf32>
    %160 = arith.addf %158, %159 : vector<8x128xf32>
    %161 = math.tanh %160 : vector<8x128xf32>
    %162 = arith.mulf %157, %161 : vector<8x128xf32>
    %c56 = arith.constant 56 : index
    %c0_43 = arith.constant 0 : index
    %163 = vector.load %arg10[%c56, %c0_43] : memref<64x512xf32, #tpu.memory_space<vmem>>, vector<8x512xf32>
    %164 = vector.extract_strided_slice %162 {offsets = [0, 0], sizes = [8, 64], strides = [1, 1]} : vector<8x128xf32> to vector<8x64xf32>
    %c0_44 = arith.constant 0 : index
    %c0_45 = arith.constant 0 : index
    %165 = vector.load %arg2[%c0_44, %c0_45] : memref<64x512xf32, #tpu.memory_space<vmem>>, vector<64x512xf32>
    %cst_46 = arith.constant dense<0.000000e+00> : vector<8x512xf32>
    %166 = tpu.matmul %164, %165, %cst_46 {dimension_numbers = #tpu.dot_dimension_numbers<[1], [0], [0], [1], [0, 0, 1, 1], [], []>} : vector<8x64xf32>, vector<64x512xf32>, vector<8x512xf32> -> vector<8x512xf32>
    %167 = arith.addf %163, %166 : vector<8x512xf32>
    %168 = vector.extract_strided_slice %167 {offsets = [0, 0], sizes = [8, 384], strides = [1, 1]} : vector<8x512xf32> to vector<8x384xf32>
    %169 = arith.negf %168 : vector<8x384xf32>
    %170 = math.exp %169 : vector<8x384xf32>
    %cst_47 = arith.constant 1.000000e+00 : f32
    %171 = vector.broadcast %cst_47 : f32 to vector<8x384xf32>
    %172 = arith.addf %171, %170 : vector<8x384xf32>
    %173 = arith.divf %171, %172 : vector<8x384xf32>
    %174 = vector.extract_strided_slice %167 {offsets = [0, 384], sizes = [8, 128], strides = [1, 1]} : vector<8x512xf32> to vector<8x128xf32>
    %175 = math.tanh %174 : vector<8x128xf32>
    %176 = vector.extract_strided_slice %173 {offsets = [0, 0], sizes = [8, 128], strides = [1, 1]} : vector<8x384xf32> to vector<8x128xf32>
    %177 = vector.extract_strided_slice %173 {offsets = [0, 128], sizes = [8, 128], strides = [1, 1]} : vector<8x384xf32> to vector<8x128xf32>
    %178 = arith.mulf %177, %160 : vector<8x128xf32>
    %179 = arith.mulf %176, %175 : vector<8x128xf32>
    %180 = arith.addf %178, %179 : vector<8x128xf32>
    %c0_48 = arith.constant 0 : index
    %c0_49 = arith.constant 0 : index
    %181 = vector.load %arg9[%c0_48, %c0_49] : memref<8x128xf32, #tpu.memory_space<vmem>>, vector<8x128xf32>
    tpu.vector_store %arg9[%c0_48, %c0_49], %180 {strides = array<i32>} : memref<8x128xf32, #tpu.memory_space<vmem>>, vector<8x128xf32>,
    %c0_i32_50 = arith.constant 0 : i32
    %182 = tpu.memref_slice %arg16[%c0_i32_50] : memref<5x!tpu.dma_semaphore, #tpu.memory_space<semaphore_mem>> -> memref<1x!tpu.dma_semaphore, #tpu.memory_space<semaphore_mem>>
    %183 = tpu.memref_squeeze %182 : memref<1x!tpu.dma_semaphore, #tpu.memory_space<semaphore_mem>> -> memref<!tpu.dma_semaphore, #tpu.memory_space<semaphore_mem>>
    tpu.wait_dma2 semaphore(%183 : memref<!tpu.dma_semaphore, #tpu.memory_space<semaphore_mem>>) src(%arg3 : memref<64x128xf32, #tpu.memory_space<any>>) dst(%arg11 : memref<64x128xf32, #tpu.memory_space<vmem>>)
    %c1_i32_51 = arith.constant 1 : i32
    %184 = tpu.memref_slice %arg16[%c1_i32_51] : memref<5x!tpu.dma_semaphore, #tpu.memory_space<semaphore_mem>> -> memref<1x!tpu.dma_semaphore, #tpu.memory_space<semaphore_mem>>
    %185 = tpu.memref_squeeze %184 : memref<1x!tpu.dma_semaphore, #tpu.memory_space<semaphore_mem>> -> memref<!tpu.dma_semaphore, #tpu.memory_space<semaphore_mem>>
    tpu.wait_dma2 semaphore(%185 : memref<!tpu.dma_semaphore, #tpu.memory_space<semaphore_mem>>) src(%arg4 : memref<1x128xf32, #tpu.memory_space<any>>) dst(%arg12 : memref<1x128xf32, #tpu.memory_space<vmem>>)
    %c2_i32_52 = arith.constant 2 : i32
    %186 = tpu.memref_slice %arg16[%c2_i32_52] : memref<5x!tpu.dma_semaphore, #tpu.memory_space<semaphore_mem>> -> memref<1x!tpu.dma_semaphore, #tpu.memory_space<semaphore_mem>>
    %187 = tpu.memref_squeeze %186 : memref<1x!tpu.dma_semaphore, #tpu.memory_space<semaphore_mem>> -> memref<!tpu.dma_semaphore, #tpu.memory_space<semaphore_mem>>
    tpu.wait_dma2 semaphore(%187 : memref<!tpu.dma_semaphore, #tpu.memory_space<semaphore_mem>>) src(%arg5 : memref<128x128xf32, #tpu.memory_space<any>>) dst(%arg13 : memref<128x128xf32, #tpu.memory_space<vmem>>)
    %c3_i32_53 = arith.constant 3 : i32
    %188 = tpu.memref_slice %arg16[%c3_i32_53] : memref<5x!tpu.dma_semaphore, #tpu.memory_space<semaphore_mem>> -> memref<1x!tpu.dma_semaphore, #tpu.memory_space<semaphore_mem>>
    %189 = tpu.memref_squeeze %188 : memref<1x!tpu.dma_semaphore, #tpu.memory_space<semaphore_mem>> -> memref<!tpu.dma_semaphore, #tpu.memory_space<semaphore_mem>>
    tpu.wait_dma2 semaphore(%189 : memref<!tpu.dma_semaphore, #tpu.memory_space<semaphore_mem>>) src(%arg6 : memref<1x128xf32, #tpu.memory_space<any>>) dst(%arg14 : memref<1x128xf32, #tpu.memory_space<vmem>>)
    %c4_i32_54 = arith.constant 4 : i32
    %190 = tpu.memref_slice %arg16[%c4_i32_54] : memref<5x!tpu.dma_semaphore, #tpu.memory_space<semaphore_mem>> -> memref<1x!tpu.dma_semaphore, #tpu.memory_space<semaphore_mem>>
    %191 = tpu.memref_squeeze %190 : memref<1x!tpu.dma_semaphore, #tpu.memory_space<semaphore_mem>> -> memref<!tpu.dma_semaphore, #tpu.memory_space<semaphore_mem>>
    tpu.wait_dma2 semaphore(%191 : memref<!tpu.dma_semaphore, #tpu.memory_space<semaphore_mem>>) src(%arg7 : memref<8x128xf32, #tpu.memory_space<any>>) dst(%arg15 : memref<8x128xf32, #tpu.memory_space<vmem>>)
    %192 = vector.extract_strided_slice %180 {offsets = [0, 0], sizes = [8, 64], strides = [1, 1]} : vector<8x128xf32> to vector<8x64xf32>
    %c0_55 = arith.constant 0 : index
    %c0_56 = arith.constant 0 : index
    %193 = vector.load %arg11[%c0_55, %c0_56] : memref<64x128xf32, #tpu.memory_space<vmem>>, vector<64x128xf32>
    %cst_57 = arith.constant dense<0.000000e+00> : vector<8x128xf32>
    %194 = tpu.matmul %192, %193, %cst_57 {dimension_numbers = #tpu.dot_dimension_numbers<[1], [0], [0], [1], [0, 0, 1, 1], [], []>} : vector<8x64xf32>, vector<64x128xf32>, vector<8x128xf32> -> vector<8x128xf32>
    %c0_58 = arith.constant 0 : index
    %c0_59 = arith.constant 0 : index
    %195 = vector.load %arg12[%c0_58, %c0_59] : memref<1x128xf32, #tpu.memory_space<vmem>>, vector<1x128xf32>
    %196 = vector.broadcast %195 : vector<1x128xf32> to vector<8x128xf32>
    %197 = arith.addf %194, %196 : vector<8x128xf32>
    %cst_60 = arith.constant 0.000000e+00 : f32
    %198 = vector.broadcast %cst_60 : f32 to vector<8x128xf32>
    %199 = arith.maximumf %197, %198 : vector<8x128xf32>
    %c0_61 = arith.constant 0 : index
    %c0_62 = arith.constant 0 : index
    %200 = vector.load %arg15[%c0_61, %c0_62] : memref<8x128xf32, #tpu.memory_space<vmem>>, vector<8x128xf32>
    %201 = arith.mulf %199, %200 : vector<8x128xf32>
    %c0_63 = arith.constant 0 : index
    %c0_64 = arith.constant 0 : index
    %202 = vector.load %arg13[%c0_63, %c0_64] : memref<128x128xf32, #tpu.memory_space<vmem>>, vector<128x128xf32>
    %cst_65 = arith.constant dense<0.000000e+00> : vector<8x128xf32>
    %203 = tpu.matmul %201, %202, %cst_65 {dimension_numbers = #tpu.dot_dimension_numbers<[1], [0], [0], [1], [0, 0, 1, 1], [], []>} : vector<8x128xf32>, vector<128x128xf32>, vector<8x128xf32> -> vector<8x128xf32>
    %c0_66 = arith.constant 0 : index
    %c0_67 = arith.constant 0 : index
    %204 = vector.load %arg14[%c0_66, %c0_67] : memref<1x128xf32, #tpu.memory_space<vmem>>, vector<1x128xf32>
    %205 = vector.broadcast %204 : vector<1x128xf32> to vector<8x128xf32>
    %206 = arith.addf %203, %205 : vector<8x128xf32>
    %c0_68 = arith.constant 0 : index
    %c0_69 = arith.constant 0 : index
    %207 = vector.load %arg8[%c0_68, %c0_69] : memref<8x128xf32, #tpu.memory_space<vmem>>, vector<8x128xf32>
    tpu.vector_store %arg8[%c0_68, %c0_69], %206 {strides = array<i32>} : memref<8x128xf32, #tpu.memory_space<vmem>>, vector<8x128xf32>,
    return
  }
}

</mosaic_0001>

<bundles_post_ra>
// kernel: fused_forward.1
= control target key start
LH: loop header
LB: loop body
LE: loop exit
PB: predicated region body
PF: predicated region fallthrough
CT: control target
= control target key end

     0   :  { %15 = vsyncpa [#allocation10], 0  ;;  %s3420_s0 = inlined_call_operand.vmem [shape: f32[64,12], index: 0, kind: input, shape index: {}]   ;;  %s3421_s1 = inlined_call_operand.hbm [shape: f32[12,512], index: 1, kind: input, shape index: {}]   ;;  %s3422_s2 = inlined_call_operand.vmem [shape: f32[64,512], index: 2, kind: input, shape index: {}]   ;;  %s3423_s3 = inlined_call_operand.hbm [shape: f32[64,128], index: 3, kind: input, shape index: {}]   ;;  %s3424_s4 = inlined_call_operand.vmem [shape: f32[1,128], index: 4, kind: input, shape index: {}]   ;;  %s3425_s5 = inlined_call_operand.hbm [shape: f32[128,128], index: 5, kind: input, shape index: {}]   ;;  %s3426_s6 = inlined_call_operand.vmem [shape: f32[1,128], index: 6, kind: input, shape index: {}]   ;;  %s3427_s7 = inlined_call_operand.vmem [shape: f32[8,128], index: 7, kind: input, shape index: {}]   ;;  %s3428_s8 = inlined_call_operand.vmem [shape: f32[8,128], index: 8, kind: output, shape index: {0}]   ;;  %s3429_s9 = inlined_call_operand.hbm [shape: f32[8,128], index: 9, kind: output, shape index: {1}]  }
   0x1   :  { %16 = vsyncpa [#allocation11], 0  ;;  %s2938_s30 = smov [#allocation9]   ;;  %s2836_s13 = scalar_lea.hbm %s3421_s1, 1024 }
   0x2   :  { %s24_s10 = sshll.u32 %s2938_s30, 4  ;;  %p2837_p0 = scmp.ne.s32.totalorder %s3421_s1, %s2836_s13  ;;  %s25_s10 = int_to_ptr.vmem [resolvable:$true] %s24_s10 }
   0x3   :  { %p2840_p1 = scmp.lt.u32.totalorder %s2836_s13, %s3421_s1 }
   0x5   :  { %p2842_p2 = pnand %p2840_p1, %p2837_p0 }
   0x7   :  { %2845 = shalt.err (!%p2842_p2)
}
   0x8   :  { %s2846_s18 = scalar_lea.vmem %s25_s10, 1024  ;;  %p2851_p4 = scmp.lt.s32.totalorder %s25_s10, %s25_s10 }
   0x9   :  { %p2847_p3 = scmp.ne.s32.totalorder %s25_s10, %s2846_s18  ;;  %p2852_p5 = scmp.lt.s32.totalorder %s2846_s18, %s2846_s18 }
   0xb   :  { %p2853_p6 = por %p2852_p5, %p2851_p4 }
   0xd   :  { %p2854_p7 = pnand %p2853_p6, %p2847_p3 }
   0xf   :  { %2857 = shalt.err (!%p2854_p7)
}
  0x10   :  { %s2939_s19 = smov 512   ;;  %s2940_s20 = smov 32  }
  0x11   :  { %30 = dma.hbm_to_vmem [thread:$0]  %s3421_s1, 1024, %s25_s10, [#allocation10], %s2939_s19, %s2939_s19, %s2940_s20  }
  0x12   :  { %2924 = dma.done.wait [#allocation10], 1024  }
  0x13   :  { %2925 = vsyncadd [#allocation10], 4294966272  ;;  %s2941_s23 = smov [#allocation3]   ;;  %s2858_s27 = scalar_lea.hbm %s3423_s3, 1024 }
  0x14   :  { %s43_s24 = sshll.u32 %s2941_s23, 4  ;;  %p2859_p8 = scmp.ne.s32.totalorder %s3423_s3, %s2858_s27  ;;  %s44_s24 = int_to_ptr.vmem [resolvable:$true] %s43_s24 }
  0x15   :  { %p2862_p9 = scmp.lt.u32.totalorder %s2858_s27, %s3423_s3 }
  0x17   :  { %p2864_p10 = pnand %p2862_p9, %p2859_p8 }
  0x19   :  { %2867 = shalt.err (!%p2864_p10)  }
  0x1a   :  { %s2868_s1 = scalar_lea.vmem %s44_s24, 1024  ;;  %p2873_p12 = scmp.lt.s32.totalorder %s44_s24, %s44_s24 }
  0x1b   :  { %p2869_p11 = scmp.ne.s32.totalorder %s44_s24, %s2868_s1  ;;  %p2874_p13 = scmp.lt.s32.totalorder %s2868_s1, %s2868_s1 }
  0x1d   :  { %p2875_p0 = por %p2874_p13, %p2873_p12 }
  0x1f   :  { %p2876_p1 = pnand %p2875_p0, %p2869_p11 }
  0x21   :  { %2879 = shalt.err (!%p2876_p1)  }
  0x22   :  { %46 = dma.hbm_to_vmem [thread:$0]  %s3423_s3, 1024, %s44_s24, [#allocation8]  ;;  %v65_v0 = vld [vmem:[%s3424_s4] sm:$0x1] }
  0x23   :  { %66 = vst [vmem:[#allocation4] sm:$0x1] %v65_v0 }
  0x24   :  { %91 = vsyncadd [#allocation8 + $0x1], 16  ;;  %v122_v1 = vld [vmem:[%s3426_s6] sm:$0x1]  ;;  %s2942_s17 = smov [#allocation5]   ;;  %s2880_s21 = scalar_lea.hbm %s3425_s5, 2048 }
  0x25   :  { %s100_s18 = sshll.u32 %s2942_s17, 4  ;;  %123 = vst [vmem:[#allocation6] sm:$0x1] %v122_v1  ;;  %p2881_p2 = scmp.ne.s32.totalorder %s3425_s5, %s2880_s21  ;;  %s101_s18 = int_to_ptr.vmem [resolvable:$true] %s100_s18 }
  0x26   :  { %p2884_p3 = scmp.lt.u32.totalorder %s2880_s21, %s3425_s5 }
  0x28   :  { %p2886_p4 = pnand %p2884_p3, %p2881_p2 }
  0x2a   :  { %2889 = shalt.err (!%p2886_p4)  }
  0x2b   :  { %s2890_s24 = scalar_lea.vmem %s101_s18, 2048  ;;  %p2895_p6 = scmp.lt.s32.totalorder %s101_s18, %s101_s18 }
  0x2c   :  { %p2891_p5 = scmp.ne.s32.totalorder %s101_s18, %s2890_s24  ;;  %p2896_p7 = scmp.lt.s32.totalorder %s2890_s24, %s2890_s24 }
  0x2e   :  { %p2897_p8 = por %p2896_p7, %p2895_p6 }
  0x30   :  { %p2898_p9 = pnand %p2897_p8, %p2891_p5 }
  0x32   :  { %2901 = shalt.err (!%p2898_p9)  }
  0x33   :  { %103 = dma.hbm_to_vmem [thread:$0]  %s3425_s5, 2048, %s101_s18, [#allocation8 + $0x2] }
  0x34   :  { %148 = vsyncadd [#allocation8 + $0x3], 16  ;;  %v3043_v2 = vld [vmem:[%s3427_s7] sm:$0xff] }
  0x35   :  { %191 = vsyncadd [#allocation8 + $0x4], 128  ;;  %v201_v3 = vld [vmem:[#allocation9 + $0x8] sm:$0xff]  ;;  %vm233_vm0 = vcmask 1043456   ;;  %v203_v6 = vld [vmem:[#allocation9 + $0x18] sm:$0xff]  ;;  %vm2943_vm1 = vmmov 1  }
  0x36   :  { %v205_v4 = vld [vmem:[#allocation9 + $0x28] sm:$0xf]  ;;  %v207_v7 = vld [vmem:[#allocation9 + $0x38] sm:$0xf]  ;;  %v200_v8 = vld [vmem:[#allocation9] sm:$0xff]  ;;  %v2944_v13 = vmov 0.0  }
  0x37   :  { %v2368_v5 = vpack.c.bf16 %v205_v4, %v201_v3  ;;  %vm3045_vm2 = vmpackc.low %vm233_vm0, %vm2943_vm1  ;;  %v2374_v10 = vpack.c.bf16 %v207_v7, %v203_v6  ;;  %v204_v11 = vld [vmem:[#allocation9 + $0x20] sm:$0xf]  ;;  %v202_v12 = vld [vmem:[#allocation9 + $0x10] sm:$0xff]  ;;  %310 = vmatprep.mubr.f32.mxu0 %v2944_v13  ;;  %423 = vmatprep.mubr.f32.mxu1 %v2944_v13  ;;  %vm208_vm3 = vcmask 97280   ;;  %vm540_vm4 = vcmask 523264  }
  0x38   :  { %v2371_v14 = vpack.c.bf16 %v204_v11, %v200_v8  ;;  %v206_v15 = vld [vmem:[#allocation9 + $0x30] sm:$0xf]  ;;  %v509_v16 = vld [vmem:[%s3422_s2 + $0x8] sm:$0xff]  ;;  %v508_v19 = vld [vmem:[%s3422_s2] sm:$0xff] }
  0x39   :  { %2370 = vmatprep.subr.msk.bf16.mxu0 %vm3045_vm2, %v2368_v5  ;;  %2376 = vmatprep.subr.msk.bf16.mxu1 %vm3045_vm2, %v2374_v10  ;;  %v2377_v17 = vpack.c.bf16 %v206_v15, %v202_v12  ;;  %v513_v18 = vld [vmem:[%s3422_s2 + $0x28] sm:$0xff]  ;;  %v512_v20 = vld [vmem:[%s3422_s2 + $0x20] sm:$0xff]  ;;  %v511_v29 = vld [vmem:[%s3422_s2 + $0x18] sm:$0xff] }
  0x3a   :  { %2373 = vmatpush1.bf16.msk.msra.mxu0 %vm3045_vm2, %v2371_v14  ;;  %v192_v21 = vld [vmem:[%s3420_s0] sm:$0xff]  ;;  %v3072_v22 = vpack.c.bf16 %v513_v18, %v509_v16  ;;  %v3074_v23 = vpack.c.bf16 %v512_v20, %v508_v19  ;;  %v517_v24 = vld [vmem:[%s3422_s2 + $0x48] sm:$0xff]  ;;  %v515_v30 = vld [vmem:[%s3422_s2 + $0x38] sm:$0xff] }
  0x3b   :  { %2379 = vmatpush1.bf16.msk.msra.mxu1 %vm3045_vm2, %v2377_v17  ;;  %v521_v25 = vld [vmem:[%s3422_s2 + $0x68] sm:$0xff]  ;;  %v516_v26 = vld [vmem:[%s3422_s2 + $0x40] sm:$0xff]  ;;  %v3100_v31 = vpack.c.bf16 %v515_v30, %v511_v29  ;;  %v510_v35 = vld [vmem:[%s3422_s2 + $0x10] sm:$0xff] }
  0x3c   :  { %2381 = vmatprep.subr.bf16.mxu0 %v3072_v22  ;;  %v3088_v27 = vpack.c.bf16 %v521_v25, %v517_v24  ;;  %v520_v28 = vld [vmem:[%s3422_s2 + $0x60] sm:$0xff]  ;;  %v525_v32 = vld [vmem:[%s3422_s2 + $0x88] sm:$0xff]  ;;  %v514_v36 = vld [vmem:[%s3422_s2 + $0x30] sm:$0xff] }
  0x3d   :  { %2225 = vmatmul.mubr.msk.f32.vlgmr.msra.gmra.mrb[0].mxu0 %vm208_vm3, %v192_v21  ;;  %v529_v33 = vld [vmem:[%s3422_s2 + $0xa8] sm:$0xff]  ;;  %v3121_v37 = vpack.c.bf16 %v520_v28, %v516_v26  ;;  %v3123_v38 = vpack.c.bf16 %v514_v36, %v510_v35  ;;  %v524_v39 = vld [vmem:[%s3422_s2 + $0x80] sm:$0xff]  ;;  %v519_v41 = vld [vmem:[%s3422_s2 + $0x58] sm:$0xff]  ;;  %2397 = vmatprep.subr.bf16.mxu1 %v3100_v31 }
  0x3e   :  { %2235 = vmatmul.mubr.msk.f32.vlgmr.msra.gmra.mrb[0].mxu1 %vm208_vm3, %v192_v21  ;;  %2383 = vmatpush1.bf16.msra.mxu0 %v3074_v23  ;;  %v193_v34 = vld [vmem:[%s3420_s0 + $0x8] sm:$0xff]  ;;  %v528_v40 = vld [vmem:[%s3422_s2 + $0xa0] sm:$0xff]  ;;  %v3136_v42 = vpack.c.bf16 %v529_v33, %v525_v32  ;;  %v523_v43 = vld [vmem:[%s3422_s2 + $0x78] sm:$0xff] }
  0x3f   :  { %316 = vmatprep.mubr.f32.mxu0 %v2944_v13  ;;  %429 = vmatprep.mubr.f32.mxu1 %v2944_v13  ;;  %v518_v44 = vld [vmem:[%s3422_s2 + $0x50] sm:$0xff]  ;;  %v3149_v46 = vpack.c.bf16 %v523_v43, %v519_v41  ;;  %v533_v48 = vld [vmem:[%s3422_s2 + $0xc8] sm:$0xff]  ;;  %v527_v51 = vld [vmem:[%s3422_s2 + $0x98] sm:$0xff]  ;;  %v3172_v53 = vpack.c.bf16 %v528_v40, %v524_v39 }
  0x40   :  { %2385 = vmatprep.subr.bf16.mxu0 %v3088_v27  ;;  %v522_v45 = vld [vmem:[%s3422_s2 + $0x70] sm:$0xff]  ;;  %2399 = vmatpush1.bf16.msra.mxu1 %v3123_v38  ;;  %v537_v49 = vld [vmem:[%s3422_s2 + $0xe8] sm:$0xff]  ;;  %v531_v52 = vld [vmem:[%s3422_s2 + $0xb8] sm:$0xff] }
  0x41   :  { %2226 = vmatmul.mubr.msk.f32.gmra.mrb[2].mxu0 %vm208_vm3, %v193_v34  ;;  %v3151_v47 = vpack.c.bf16 %v522_v45, %v518_v44  ;;  %v194_v50 = vld [vmem:[%s3420_s0 + $0x10] sm:$0xff]  ;;  %2401 = vmatprep.subr.bf16.mxu1 %v3149_v46  ;;  %v3182_v56 = vpack.c.bf16 %v537_v49, %v533_v48  ;;  %v3184_v57 = vpack.c.bf16 %v531_v52, %v527_v51  ;;  %v532_v58 = vld [vmem:[%s3422_s2 + $0xc0] sm:$0xff]  ;;  %v535_v61 = vld [vmem:[%s3422_s2 + $0xd8] sm:$0xff] }
  0x42   :  { %2236 = vmatmul.mubr.msk.f32.gmra.mrb[2].mxu1 %vm208_vm3, %v193_v34  ;;  %322 = vmatprep.mubr.f32.mxu0 %v2944_v13  ;;  %v526_v54 = vld [vmem:[%s3422_s2 + $0x90] sm:$0xff]  ;;  %v536_v59 = vld [vmem:[%s3422_s2 + $0xe0] sm:$0xff]  ;;  %v539_v62 = vld [vmem:[%s3422_s2 + $0xf8] sm:$0xff] }
  0x43   :  { %435 = vmatprep.mubr.f32.mxu1 %v2944_v13  ;;  %2387 = vmatpush1.bf16.msra.mxu0 %v3121_v37  ;;  %v530_v55 = vld [vmem:[%s3422_s2 + $0xb0] sm:$0xff]  ;;  %v195_v63 = vld [vmem:[%s3420_s0 + $0x18] sm:$0xff]  ;;  %v3215_v3 = vpack.c.bf16 %v536_v59, %v532_v58  ;;  %v3219_v4 = vpack.c.bf16 %v539_v62, %v535_v61  ;;  %v196_v6 = vld [vmem:[%s3420_s0 + $0x20] sm:$0xff] }
  0x44   :  { %2389 = vmatprep.subr.bf16.mxu0 %v3136_v42  ;;  %2403 = vmatpush1.bf16.msra.mxu1 %v3151_v47  ;;  %v3194_v60 = vpack.c.bf16 %v530_v55, %v526_v54  ;;  %v534_v0 = vld [vmem:[%s3422_s2 + $0xd0] sm:$0xff]  ;;  %v197_v7 = vld [vmem:[%s3420_s0 + $0x28] sm:$0xff]  ;;  %v199_v9 = vld [vmem:[%s3420_s0 + $0x38] sm:$0xff] }
  0x45   :  { %2227 = vmatmul.mubr.msk.f32.gmra.mrb[4].mxu0 %vm208_vm3, %v194_v50  ;;  %v538_v1 = vld [vmem:[%s3422_s2 + $0xf0] sm:$0xff]  ;;  %2405 = vmatprep.subr.bf16.mxu1 %v3184_v57 }
  0x46   :  { %2237 = vmatmul.mubr.msk.f32.gmra.mrb[4].mxu1 %vm208_vm3, %v194_v50  ;;  %328 = vmatprep.mubr.f32.mxu0 %v2944_v13  ;;  %v3223_v5 = vpack.c.bf16 %v538_v1, %v534_v0  ;;  %v198_v8 = vld [vmem:[%s3420_s0 + $0x30] sm:$0xff] }
  0x47   :  { %441 = vmatprep.mubr.f32.mxu1 %v2944_v13  ;;  %2391 = vmatpush1.bf16.msra.mxu0 %v3172_v53 }
  0x48   :  { %2393 = vmatprep.subr.bf16.mxu0 %v3182_v56  ;;  %2407 = vmatpush1.bf16.msra.mxu1 %v3194_v60 }
  0x49   :  { %2228 = vmatmul.mubr.msk.f32.gmra.mrb[6].mxu0 %vm208_vm3, %v195_v63  ;;  %2409 = vmatprep.subr.bf16.mxu1 %v3219_v4 }
  0x4a   :  { %2238 = vmatmul.mubr.msk.f32.gmra.mrb[6].mxu1 %vm208_vm3, %v195_v63  ;;  %334 = vmatprep.mubr.f32.mxu0 %v2944_v13 }
  0x4b   :  { %447 = vmatprep.mubr.f32.mxu1 %v2944_v13  ;;  %2395 = vmatpush1.bf16.msra.mxu0 %v3215_v3 }
  0x4c   :  { %2413 = vmatprep.subr.bf16.mxu0 %v3072_v22  ;;  %2411 = vmatpush1.bf16.msra.mxu1 %v3223_v5 }
  0x4d   :  { %2229 = vmatmul.mubr.msk.f32.gmra.mrb[8].mxu0 %vm208_vm3, %v196_v6  ;;  %2429 = vmatprep.subr.bf16.mxu1 %v3100_v31 }
  0x4e   :  { %2239 = vmatmul.mubr.msk.f32.gmra.mrb[8].mxu1 %vm208_vm3, %v196_v6  ;;  %340 = vmatprep.mubr.f32.mxu0 %v2944_v13 }
  0x4f   :  { %453 = vmatprep.mubr.f32.mxu1 %v2944_v13 }
  0x51   :  { %2230 = vmatmul.mubr.msk.f32.gmra.mrb[10].mxu0 %vm208_vm3, %v197_v7 }
  0x52   :  { %2240 = vmatmul.mubr.msk.f32.gmra.mrb[10].mxu1 %vm208_vm3, %v197_v7  ;;  %346 = vmatprep.mubr.f32.mxu0 %v2944_v13 }
  0x53   :  { %459 = vmatprep.mubr.f32.mxu1 %v2944_v13 }
  0x55   :  { %2231 = vmatmul.mubr.msk.f32.gmra.mrb[12].mxu0 %vm208_vm3, %v198_v8 }
  0x56   :  { %2241 = vmatmul.mubr.msk.f32.gmra.mrb[12].mxu1 %vm208_vm3, %v198_v8  ;;  %352 = vmatprep.mubr.f32.mxu0 %v2944_v13 }
  0x57   :  { %465 = vmatprep.mubr.f32.mxu1 %v2944_v13 }
  0x59   :  { %2232 = vmatmul.mubr.msk.f32.gmra.mrb[14].mxu0 %vm208_vm3, %v199_v9 }
  0x5a   :  { %2242 = vmatmul.mubr.msk.f32.gmra.mrb[14].mxu1 %vm208_vm3, %v199_v9  ;;  %608 = vmatprep.mubr.f32.mxu0 %v2944_v13 }
  0x5b   :  { %679 = vmatprep.mubr.f32.mxu1 %v2944_v13 }
  0x5d   :  { %609 = vmatmul.mubr.f32.vlgmr.msra.gmra.mrb[0].mxu0 %v2944_v13 }
  0x5e   :  { %680 = vmatmul.mubr.f32.vlgmr.msra.gmra.mrb[0].mxu1 %v2944_v13  ;;  %2415 = vmatpush1.bf16.msra.mxu0 %v3074_v23 }
  0x5f   :  { %2431 = vmatpush1.bf16.msra.mxu1 %v3123_v38  ;;  %2417 = vmatprep.subr.bf16.mxu0 %v3088_v27 }
  0x60   :  { %2433 = vmatprep.subr.bf16.mxu1 %v3149_v46  ;;  %785 = vmatprep.mubr.f32.mxu0 %v2944_v13 }
  0x61   :  { %856 = vmatprep.mubr.f32.mxu1 %v2944_v13 }
  0x62   :  { %2419 = vmatpush1.bf16.msra.mxu0 %v3121_v37 }
  0x63   :  { %2435 = vmatpush1.bf16.msra.mxu1 %v3151_v47  ;;  %2421 = vmatprep.subr.bf16.mxu0 %v3136_v42 }
  0x64   :  { %2437 = vmatprep.subr.bf16.mxu1 %v3184_v57 }
  0x66   :  { %2423 = vmatpush1.bf16.msra.mxu0 %v3172_v53 }
  0x67   :  { %2439 = vmatpush1.bf16.msra.mxu1 %v3194_v60  ;;  %2425 = vmatprep.subr.bf16.mxu0 %v3182_v56 }
  0x68   :  { %2441 = vmatprep.subr.bf16.mxu1 %v3219_v4 }
  0x6a   :  { %2427 = vmatpush1.bf16.msra.mxu0 %v3215_v3 }
  0x6b   :  { %2443 = vmatpush1.bf16.msra.mxu1 %v3223_v5  ;;  %2445 = vmatprep.subr.bf16.mxu0 %v3072_v22 }
  0x6c   :  { %2461 = vmatprep.subr.bf16.mxu1 %v3100_v31 }
 0x130   :  { %v610_v10 = vpop.f32.mrb[0].mxu0 }
 0x131   :  { %v2243_v11 = vmul.f32 -1.442695, %v610_v10  ;;  %v681_v12 = vpop.f32.mrb[0].mxu1  ;;  %v612_v14 = vpop.f32.mrb[1].mxu0 }
 0x132   :  { %v2244_v15 = vmul.f32 -1.442695, %v612_v14  ;;  %v683_v16 = vpop.f32.mrb[1].mxu1  ;;  %v2245_v17 = vmul.f32 -1.442695, %v681_v12 }
 0x133   :  { %2714 = vpow2.f32 %v2243_v11 }
 0x134   :  { %2716 = vpow2.f32 %v2244_v15 }
 0x135   :  { %2718 = vpow2.f32 %v2245_v17 }
 0x136   :  { %2720 = vtanh.f32 %v683_v16 }
 0x13d   :  { %v2715_v18 = vpop.eup %2714 }
 0x13e   :  { %v699_v19 = vadd.f32 1.0, %v2715_v18  ;;  %v2717_v20 = vpop.eup %2716 }
 0x13f   :  { %v700_v21 = vadd.f32 1.0, %v2717_v20  ;;  %v2719_v24 = vpop.eup %2718 }
 0x140   :  { %2722 = vrcp.f32 %v699_v19  ;;  %v2721_v25 = vpop.eup %2720  ;;  %v701_v30 = vadd.f32 1.0, %v2719_v24 }
 0x141   :  { %2724 = vrcp.f32 %v700_v21 }
 0x142   :  { %2726 = vrcp.f32 %v701_v30 }
 0x14a   :  { %v2723_v26 = vpop.eup %2722 }
 0x14b   :  { %v710_v28 = vmul.f32 %v2723_v26, %v2721_v25  ;;  %v2725_v29 = vpop.eup %2724 }
 0x14c   :  { %v709_v32 = vmul.f32 0.0, %v2725_v29  ;;  %v2727_v34 = vpop.eup %2726 }
 0x14e   :  { %v711_v33 = vadd.f32 %v710_v28, %v709_v32 }
 0x150   :  { %2728 = vtanh.f32 %v711_v33 }
 0x15a   :  { %v2729_v35 = vpop.eup %2728 }
 0x15b   :  { %v713_v36 = vmul.f32 %v2729_v35, %v2727_v34 }
 0x15d   :  { %2246 = vmatmul.mubr.msk.f32.vlgmr.msra.gmra.mrb[2].mxu0 %vm540_vm4, %v713_v36  ;;  %2247 = vmatmul.mubr.msk.f32.vlgmr.msra.gmra.mrb[2].mxu1 %vm540_vm4, %v713_v36 }
 0x15e   :  { %2447 = vmatpush1.bf16.msra.mxu0 %v3074_v23  ;;  %2463 = vmatpush1.bf16.msra.mxu1 %v3123_v38 }
 0x15f   :  { %2449 = vmatprep.subr.bf16.mxu0 %v3088_v27  ;;  %2465 = vmatprep.subr.bf16.mxu1 %v3149_v46 }
 0x160   :  { %962 = vmatprep.mubr.f32.mxu0 %v2944_v13  ;;  %1033 = vmatprep.mubr.f32.mxu1 %v2944_v13 }
 0x162   :  { %2451 = vmatpush1.bf16.msra.mxu0 %v3121_v37  ;;  %2467 = vmatpush1.bf16.msra.mxu1 %v3151_v47 }
 0x163   :  { %2453 = vmatprep.subr.bf16.mxu0 %v3136_v42  ;;  %2469 = vmatprep.subr.bf16.mxu1 %v3184_v57 }
 0x166   :  { %2455 = vmatpush1.bf16.msra.mxu0 %v3172_v53  ;;  %2471 = vmatpush1.bf16.msra.mxu1 %v3194_v60 }
 0x167   :  { %2457 = vmatprep.subr.bf16.mxu0 %v3182_v56  ;;  %2473 = vmatprep.subr.bf16.mxu1 %v3219_v4 }
 0x16a   :  { %2459 = vmatpush1.bf16.msra.mxu0 %v3215_v3  ;;  %2475 = vmatpush1.bf16.msra.mxu1 %v3223_v5 }
 0x16b   :  { %2477 = vmatprep.subr.bf16.mxu0 %v3072_v22  ;;  %2493 = vmatprep.subr.bf16.mxu1 %v3100_v31 }
 0x230   :  { %v787_v39 = vpop.f32.mrb[2].mxu0  ;;  %v858_v40 = vpop.f32.mrb[2].mxu1 }
 0x231   :  { %v2248_v41 = vmul.f32 -1.442695, %v787_v39  ;;  %v789_v43 = vpop.f32.mrb[3].mxu0  ;;  %v860_v44 = vpop.f32.mrb[3].mxu1  ;;  %v2250_v48 = vmul.f32 -1.442695, %v858_v40 }
 0x232   :  { %v2249_v45 = vmul.f32 -1.442695, %v789_v43 }
 0x233   :  { %2730 = vpow2.f32 %v2248_v41 }
 0x234   :  { %2732 = vpow2.f32 %v2249_v45 }
 0x235   :  { %2734 = vtanh.f32 %v860_v44 }
 0x236   :  { %2736 = vpow2.f32 %v2250_v48 }
 0x23d   :  { %v2731_v49 = vpop.eup %2730 }
 0x23e   :  { %v876_v50 = vadd.f32 1.0, %v2731_v49  ;;  %v2733_v51 = vpop.eup %2732 }
 0x23f   :  { %v877_v52 = vadd.f32 1.0, %v2733_v51  ;;  %v2735_v54 = vpop.eup %2734 }
 0x240   :  { %2738 = vrcp.f32 %v876_v50  ;;  %v2737_v55 = vpop.eup %2736 }
 0x241   :  { %2740 = vrcp.f32 %v877_v52  ;;  %v878_v62 = vadd.f32 1.0, %v2737_v55 }
 0x243   :  { %2742 = vrcp.f32 %v878_v62 }
 0x24a   :  { %v2739_v58 = vpop.eup %2738 }
 0x24b   :  { %v887_v59 = vmul.f32 %v2739_v58, %v2735_v54  ;;  %v2741_v61 = vpop.eup %2740 }
 0x24c   :  { %v886_v63 = vmul.f32 %v2741_v61, %v711_v33 }
 0x24d   :  { %v2743_v1 = vpop.eup %2742 }
 0x24e   :  { %v888_v0 = vadd.f32 %v887_v59, %v886_v63 }
 0x250   :  { %2744 = vtanh.f32 %v888_v0 }
 0x25a   :  { %v2745_v6 = vpop.eup %2744 }
 0x25b   :  { %v890_v7 = vmul.f32 %v2745_v6, %v2743_v1 }
 0x25d   :  { %2251 = vmatmul.mubr.msk.f32.vlgmr.msra.gmra.mrb[4].mxu0 %vm540_vm4, %v890_v7  ;;  %2252 = vmatmul.mubr.msk.f32.vlgmr.msra.gmra.mrb[4].mxu1 %vm540_vm4, %v890_v7 }
 0x25e   :  { %2479 = vmatpush1.bf16.msra.mxu0 %v3074_v23  ;;  %2495 = vmatpush1.bf16.msra.mxu1 %v3123_v38 }
 0x25f   :  { %2481 = vmatprep.subr.bf16.mxu0 %v3088_v27  ;;  %2497 = vmatprep.subr.bf16.mxu1 %v3149_v46 }
 0x260   :  { %1139 = vmatprep.mubr.f32.mxu0 %v2944_v13  ;;  %1210 = vmatprep.mubr.f32.mxu1 %v2944_v13 }
 0x262   :  { %2483 = vmatpush1.bf16.msra.mxu0 %v3121_v37  ;;  %2499 = vmatpush1.bf16.msra.mxu1 %v3151_v47 }
 0x263   :  { %2485 = vmatprep.subr.bf16.mxu0 %v3136_v42  ;;  %2501 = vmatprep.subr.bf16.mxu1 %v3184_v57 }
 0x266   :  { %2487 = vmatpush1.bf16.msra.mxu0 %v3172_v53  ;;  %2503 = vmatpush1.bf16.msra.mxu1 %v3194_v60 }
 0x267   :  { %2489 = vmatprep.subr.bf16.mxu0 %v3182_v56  ;;  %2505 = vmatprep.subr.bf16.mxu1 %v3219_v4 }
 0x26a   :  { %2491 = vmatpush1.bf16.msra.mxu0 %v3215_v3  ;;  %2507 = vmatpush1.bf16.msra.mxu1 %v3223_v5 }
 0x26b   :  { %2509 = vmatprep.subr.bf16.mxu0 %v3072_v22  ;;  %2525 = vmatprep.subr.bf16.mxu1 %v3100_v31 }
 0x330   :  { %v964_v8 = vpop.f32.mrb[4].mxu0  ;;  %v1035_v9 = vpop.f32.mrb[4].mxu1 }
 0x331   :  { %v2253_v10 = vmul.f32 -1.442695, %v964_v8  ;;  %v966_v11 = vpop.f32.mrb[5].mxu0  ;;  %v1037_v12 = vpop.f32.mrb[5].mxu1  ;;  %v2255_v15 = vmul.f32 -1.442695, %v1035_v9 }
 0x332   :  { %v2254_v14 = vmul.f32 -1.442695, %v966_v11 }
 0x333   :  { %2746 = vpow2.f32 %v2253_v10 }
 0x334   :  { %2748 = vpow2.f32 %v2254_v14 }
 0x335   :  { %2750 = vtanh.f32 %v1037_v12 }
 0x336   :  { %2752 = vpow2.f32 %v2255_v15 }
 0x33d   :  { %v2747_v16 = vpop.eup %2746 }
 0x33e   :  { %v1053_v17 = vadd.f32 1.0, %v2747_v16  ;;  %v2749_v18 = vpop.eup %2748 }
 0x33f   :  { %v1054_v19 = vadd.f32 1.0, %v2749_v18  ;;  %v2751_v20 = vpop.eup %2750 }
 0x340   :  { %2754 = vrcp.f32 %v1053_v17  ;;  %v2753_v21 = vpop.eup %2752 }
 0x341   :  { %2756 = vrcp.f32 %v1054_v19  ;;  %v1055_v28 = vadd.f32 1.0, %v2753_v21 }
 0x343   :  { %2758 = vrcp.f32 %v1055_v28 }
 0x34a   :  { %v2755_v24 = vpop.eup %2754 }
 0x34b   :  { %v1064_v25 = vmul.f32 %v2755_v24, %v2751_v20  ;;  %v2757_v26 = vpop.eup %2756 }
 0x34c   :  { %v1063_v29 = vmul.f32 %v2757_v26, %v888_v0 }
 0x34d   :  { %v2759_v32 = vpop.eup %2758 }
 0x34e   :  { %v1065_v30 = vadd.f32 %v1064_v25, %v1063_v29 }
 0x350   :  { %2760 = vtanh.f32 %v1065_v30 }
 0x35a   :  { %v2761_v33 = vpop.eup %2760 }
 0x35b   :  { %v1067_v34 = vmul.f32 %v2761_v33, %v2759_v32 }
 0x35d   :  { %2256 = vmatmul.mubr.msk.f32.vlgmr.msra.gmra.mrb[6].mxu0 %vm540_vm4, %v1067_v34  ;;  %2257 = vmatmul.mubr.msk.f32.vlgmr.msra.gmra.mrb[6].mxu1 %vm540_vm4, %v1067_v34 }
 0x35e   :  { %2511 = vmatpush1.bf16.msra.mxu0 %v3074_v23  ;;  %2527 = vmatpush1.bf16.msra.mxu1 %v3123_v38 }
 0x35f   :  { %2513 = vmatprep.subr.bf16.mxu0 %v3088_v27  ;;  %2529 = vmatprep.subr.bf16.mxu1 %v3149_v46 }
 0x360   :  { %1316 = vmatprep.mubr.f32.mxu0 %v2944_v13  ;;  %1387 = vmatprep.mubr.f32.mxu1 %v2944_v13 }
 0x362   :  { %2515 = vmatpush1.bf16.msra.mxu0 %v3121_v37  ;;  %2531 = vmatpush1.bf16.msra.mxu1 %v3151_v47 }
 0x363   :  { %2517 = vmatprep.subr.bf16.mxu0 %v3136_v42  ;;  %2533 = vmatprep.subr.bf16.mxu1 %v3184_v57 }
 0x366   :  { %2519 = vmatpush1.bf16.msra.mxu0 %v3172_v53  ;;  %2535 = vmatpush1.bf16.msra.mxu1 %v3194_v60 }
 0x367   :  { %2521 = vmatprep.subr.bf16.mxu0 %v3182_v56  ;;  %2537 = vmatprep.subr.bf16.mxu1 %v3219_v4 }
 0x36a   :  { %2523 = vmatpush1.bf16.msra.mxu0 %v3215_v3  ;;  %2539 = vmatpush1.bf16.msra.mxu1 %v3223_v5 }
 0x36b   :  { %2541 = vmatprep.subr.bf16.mxu0 %v3072_v22  ;;  %2557 = vmatprep.subr.bf16.mxu1 %v3100_v31 }
 0x430   :  { %v1141_v35 = vpop.f32.mrb[6].mxu0  ;;  %v1212_v36 = vpop.f32.mrb[6].mxu1 }
 0x431   :  { %v2258_v39 = vmul.f32 -1.442695, %v1141_v35  ;;  %v1143_v40 = vpop.f32.mrb[7].mxu0  ;;  %v1214_v41 = vpop.f32.mrb[7].mxu1  ;;  %v2260_v44 = vmul.f32 -1.442695, %v1212_v36 }
 0x432   :  { %v2259_v43 = vmul.f32 -1.442695, %v1143_v40 }
 0x433   :  { %2762 = vpow2.f32 %v2258_v39 }
 0x434   :  { %2764 = vpow2.f32 %v2259_v43 }
 0x435   :  { %2766 = vtanh.f32 %v1214_v41 }
 0x436   :  { %2768 = vpow2.f32 %v2260_v44 }
 0x43d   :  { %v2763_v45 = vpop.eup %2762 }
 0x43e   :  { %v1230_v48 = vadd.f32 1.0, %v2763_v45  ;;  %v2765_v49 = vpop.eup %2764 }
 0x43f   :  { %v1231_v50 = vadd.f32 1.0, %v2765_v49  ;;  %v2767_v51 = vpop.eup %2766 }
 0x440   :  { %2770 = vrcp.f32 %v1230_v48  ;;  %v2769_v52 = vpop.eup %2768 }
 0x441   :  { %2772 = vrcp.f32 %v1231_v50  ;;  %v1232_v59 = vadd.f32 1.0, %v2769_v52 }
 0x443   :  { %2774 = vrcp.f32 %v1232_v59 }
 0x44a   :  { %v2771_v54 = vpop.eup %2770 }
 0x44b   :  { %v1241_v55 = vmul.f32 %v2771_v54, %v2767_v51  ;;  %v2773_v58 = vpop.eup %2772 }
 0x44c   :  { %v1240_v61 = vmul.f32 %v2773_v58, %v1065_v30 }
 0x44d   :  { %v2775_v63 = vpop.eup %2774 }
 0x44e   :  { %v1242_v62 = vadd.f32 %v1241_v55, %v1240_v61 }
 0x450   :  { %2776 = vtanh.f32 %v1242_v62 }
 0x45a   :  { %v2777_v0 = vpop.eup %2776 }
 0x45b   :  { %v1244_v1 = vmul.f32 %v2777_v0, %v2775_v63 }
 0x45d   :  { %2261 = vmatmul.mubr.msk.f32.vlgmr.msra.gmra.mrb[8].mxu0 %vm540_vm4, %v1244_v1  ;;  %2262 = vmatmul.mubr.msk.f32.vlgmr.msra.gmra.mrb[8].mxu1 %vm540_vm4, %v1244_v1 }
 0x45e   :  { %2543 = vmatpush1.bf16.msra.mxu0 %v3074_v23  ;;  %2559 = vmatpush1.bf16.msra.mxu1 %v3123_v38 }
 0x45f   :  { %2545 = vmatprep.subr.bf16.mxu0 %v3088_v27  ;;  %2561 = vmatprep.subr.bf16.mxu1 %v3149_v46 }
 0x460   :  { %1493 = vmatprep.mubr.f32.mxu0 %v2944_v13  ;;  %1564 = vmatprep.mubr.f32.mxu1 %v2944_v13 }
 0x462   :  { %2547 = vmatpush1.bf16.msra.mxu0 %v3121_v37  ;;  %2563 = vmatpush1.bf16.msra.mxu1 %v3151_v47 }
 0x463   :  { %2549 = vmatprep.subr.bf16.mxu0 %v3136_v42  ;;  %2565 = vmatprep.subr.bf16.mxu1 %v3184_v57 }
 0x466   :  { %2551 = vmatpush1.bf16.msra.mxu0 %v3172_v53  ;;  %2567 = vmatpush1.bf16.msra.mxu1 %v3194_v60 }
 0x467   :  { %2553 = vmatprep.subr.bf16.mxu0 %v3182_v56  ;;  %2569 = vmatprep.subr.bf16.mxu1 %v3219_v4 }
 0x46a   :  { %2555 = vmatpush1.bf16.msra.mxu0 %v3215_v3  ;;  %2571 = vmatpush1.bf16.msra.mxu1 %v3223_v5 }
 0x46b   :  { %2573 = vmatprep.subr.bf16.mxu0 %v3072_v22  ;;  %2589 = vmatprep.subr.bf16.mxu1 %v3100_v31 }
 0x530   :  { %v1318_v6 = vpop.f32.mrb[8].mxu0  ;;  %v1389_v7 = vpop.f32.mrb[8].mxu1 }
 0x531   :  { %v2263_v8 = vmul.f32 -1.442695, %v1318_v6  ;;  %v1320_v9 = vpop.f32.mrb[9].mxu0  ;;  %v1391_v10 = vpop.f32.mrb[9].mxu1  ;;  %v2265_v12 = vmul.f32 -1.442695, %v1389_v7 }
 0x532   :  { %v2264_v11 = vmul.f32 -1.442695, %v1320_v9 }
 0x533   :  { %2778 = vpow2.f32 %v2263_v8 }
 0x534   :  { %2780 = vpow2.f32 %v2264_v11 }
 0x535   :  { %2782 = vtanh.f32 %v1391_v10 }
 0x536   :  { %2784 = vpow2.f32 %v2265_v12 }
 0x53d   :  { %v2779_v14 = vpop.eup %2778 }
 0x53e   :  { %v1407_v15 = vadd.f32 1.0, %v2779_v14  ;;  %v2781_v16 = vpop.eup %2780 }
 0x53f   :  { %v1408_v17 = vadd.f32 1.0, %v2781_v16  ;;  %v2783_v18 = vpop.eup %2782 }
 0x540   :  { %2786 = vrcp.f32 %v1407_v15  ;;  %v2785_v19 = vpop.eup %2784 }
 0x541   :  { %2788 = vrcp.f32 %v1408_v17  ;;  %v1409_v25 = vadd.f32 1.0, %v2785_v19 }
 0x543   :  { %2790 = vrcp.f32 %v1409_v25 }
 0x54a   :  { %v2787_v20 = vpop.eup %2786 }
 0x54b   :  { %v1418_v21 = vmul.f32 %v2787_v20, %v2783_v18  ;;  %v2789_v24 = vpop.eup %2788 }
 0x54c   :  { %v1417_v26 = vmul.f32 %v2789_v24, %v1242_v62 }
 0x54d   :  { %v2791_v29 = vpop.eup %2790 }
 0x54e   :  { %v1419_v28 = vadd.f32 %v1418_v21, %v1417_v26 }
 0x550   :  { %2792 = vtanh.f32 %v1419_v28 }
 0x55a   :  { %v2793_v30 = vpop.eup %2792 }
 0x55b   :  { %v1421_v32 = vmul.f32 %v2793_v30, %v2791_v29 }
 0x55d   :  { %2266 = vmatmul.mubr.msk.f32.vlgmr.msra.gmra.mrb[10].mxu0 %vm540_vm4, %v1421_v32  ;;  %2267 = vmatmul.mubr.msk.f32.vlgmr.msra.gmra.mrb[10].mxu1 %vm540_vm4, %v1421_v32 }
 0x55e   :  { %2575 = vmatpush1.bf16.msra.mxu0 %v3074_v23  ;;  %2591 = vmatpush1.bf16.msra.mxu1 %v3123_v38 }
 0x55f   :  { %2577 = vmatprep.subr.bf16.mxu0 %v3088_v27  ;;  %2593 = vmatprep.subr.bf16.mxu1 %v3149_v46 }
 0x560   :  { %1670 = vmatprep.mubr.f32.mxu0 %v2944_v13  ;;  %1741 = vmatprep.mubr.f32.mxu1 %v2944_v13 }
 0x562   :  { %2579 = vmatpush1.bf16.msra.mxu0 %v3121_v37  ;;  %2595 = vmatpush1.bf16.msra.mxu1 %v3151_v47 }
 0x563   :  { %2581 = vmatprep.subr.bf16.mxu0 %v3136_v42  ;;  %2597 = vmatprep.subr.bf16.mxu1 %v3184_v57 }
 0x566   :  { %2583 = vmatpush1.bf16.msra.mxu0 %v3172_v53  ;;  %2599 = vmatpush1.bf16.msra.mxu1 %v3194_v60 }
 0x567   :  { %2585 = vmatprep.subr.bf16.mxu0 %v3182_v56  ;;  %2601 = vmatprep.subr.bf16.mxu1 %v3219_v4 }
 0x56a   :  { %2587 = vmatpush1.bf16.msra.mxu0 %v3215_v3  ;;  %2603 = vmatpush1.bf16.msra.mxu1 %v3223_v5 }
 0x56b   :  { %2605 = vmatprep.subr.bf16.mxu0 %v3072_v22  ;;  %2621 = vmatprep.subr.bf16.mxu1 %v3100_v31 }
 0x630   :  { %v1495_v33 = vpop.f32.mrb[10].mxu0  ;;  %v1566_v34 = vpop.f32.mrb[10].mxu1 }
 0x631   :  { %v2268_v35 = vmul.f32 -1.442695, %v1495_v33  ;;  %v1497_v36 = vpop.f32.mrb[11].mxu0  ;;  %v1568_v39 = vpop.f32.mrb[11].mxu1  ;;  %v2270_v41 = vmul.f32 -1.442695, %v1566_v34 }
 0x632   :  { %v2269_v40 = vmul.f32 -1.442695, %v1497_v36 }
 0x633   :  { %2794 = vpow2.f32 %v2268_v35 }
 0x634   :  { %2796 = vpow2.f32 %v2269_v40 }
 0x635   :  { %2798 = vtanh.f32 %v1568_v39 }
 0x636   :  { %2800 = vpow2.f32 %v2270_v41 }
 0x63d   :  { %v2795_v43 = vpop.eup %2794 }
 0x63e   :  { %v1584_v44 = vadd.f32 1.0, %v2795_v43  ;;  %v2797_v45 = vpop.eup %2796 }
 0x63f   :  { %v1585_v48 = vadd.f32 1.0, %v2797_v45  ;;  %v2799_v22 = vpop.eup %2798 }
 0x640   :  { %2802 = vrcp.f32 %v1584_v44  ;;  %v2801_v49 = vpop.eup %2800 }
 0x641   :  { %2804 = vrcp.f32 %v1585_v48  ;;  %v1586_v52 = vadd.f32 1.0, %v2801_v49 }
 0x643   :  { %2806 = vrcp.f32 %v1586_v52 }
 0x64a   :  { %v2803_v31 = vpop.eup %2802 }
 0x64b   :  { %v1595_v50 = vmul.f32 %v2803_v31, %v2799_v22  ;;  %v2805_v51 = vpop.eup %2804 }
 0x64c   :  { %v1594_v54 = vmul.f32 %v2805_v51, %v1419_v28 }
 0x64d   :  { %v2807_v58 = vpop.eup %2806 }
 0x64e   :  { %v1596_v55 = vadd.f32 %v1595_v50, %v1594_v54 }
 0x650   :  { %2808 = vtanh.f32 %v1596_v55 }
 0x65a   :  { %v2809_v59 = vpop.eup %2808 }
 0x65b   :  { %v1598_v61 = vmul.f32 %v2809_v59, %v2807_v58 }
 0x65d   :  { %2271 = vmatmul.mubr.msk.f32.vlgmr.msra.gmra.mrb[12].mxu0 %vm540_vm4, %v1598_v61  ;;  %2272 = vmatmul.mubr.msk.f32.vlgmr.msra.gmra.mrb[12].mxu1 %vm540_vm4, %v1598_v61 }
 0x65e   :  { %2607 = vmatpush1.bf16.msra.mxu0 %v3074_v23  ;;  %2623 = vmatpush1.bf16.msra.mxu1 %v3123_v38 }
 0x65f   :  { %2609 = vmatprep.subr.bf16.mxu0 %v3088_v27  ;;  %2625 = vmatprep.subr.bf16.mxu1 %v3149_v46 }
 0x660   :  { %1846 = vmatprep.mubr.f32.mxu0 %v2944_v13  ;;  %1917 = vmatprep.mubr.f32.mxu1 %v2944_v13 }
 0x662   :  { %2611 = vmatpush1.bf16.msra.mxu0 %v3121_v37  ;;  %2627 = vmatpush1.bf16.msra.mxu1 %v3151_v47 }
 0x663   :  { %2613 = vmatprep.subr.bf16.mxu0 %v3136_v42  ;;  %2629 = vmatprep.subr.bf16.mxu1 %v3184_v57 }
 0x666   :  { %2615 = vmatpush1.bf16.msra.mxu0 %v3172_v53  ;;  %2631 = vmatpush1.bf16.msra.mxu1 %v3194_v60 }
 0x667   :  { %2617 = vmatprep.subr.bf16.mxu0 %v3182_v56  ;;  %2633 = vmatprep.subr.bf16.mxu1 %v3219_v4 }
 0x66a   :  { %2619 = vmatpush1.bf16.msra.mxu0 %v3215_v3  ;;  %2635 = vmatpush1.bf16.msra.mxu1 %v3223_v5 }
 0x730   :  { %v1672_v23 = vpop.f32.mrb[12].mxu0  ;;  %v1743_v27 = vpop.f32.mrb[12].mxu1 }
 0x731   :  { %v2273_v37 = vmul.f32 -1.442695, %v1672_v23  ;;  %v1674_v38 = vpop.f32.mrb[13].mxu0  ;;  %v1745_v46 = vpop.f32.mrb[13].mxu1  ;;  %v2275_v47 = vmul.f32 -1.442695, %v1743_v27 }
 0x732   :  { %v2274_v42 = vmul.f32 -1.442695, %v1674_v38 }
 0x733   :  { %2810 = vpow2.f32 %v2273_v37 }
 0x734   :  { %2812 = vpow2.f32 %v2274_v42 }
 0x735   :  { %2814 = vtanh.f32 %v1745_v46 }
 0x736   :  { %2816 = vpow2.f32 %v2275_v47 }
 0x73d   :  { %v2811_v53 = vpop.eup %2810 }
 0x73e   :  { %v1761_v57 = vadd.f32 1.0, %v2811_v53  ;;  %v2813_v60 = vpop.eup %2812 }
 0x73f   :  { %v1762_v56 = vadd.f32 1.0, %v2813_v60  ;;  %v2815_v3 = vpop.eup %2814 }
 0x740   :  { %2818 = vrcp.f32 %v1761_v57  ;;  %v2817_v4 = vpop.eup %2816 }
 0x741   :  { %2820 = vrcp.f32 %v1762_v56  ;;  %v1763_v0 = vadd.f32 1.0, %v2817_v4 }
 0x743   :  { %2822 = vrcp.f32 %v1763_v0 }
 0x74a   :  { %v2819_v5 = vpop.eup %2818 }
 0x74b   :  { %v1772_v62 = vmul.f32 %v2819_v5, %v2815_v3  ;;  %v2821_v63 = vpop.eup %2820 }
 0x74c   :  { %v1771_v1 = vmul.f32 %v2821_v63, %v1596_v55 }
 0x74d   :  { %v2823_v7 = vpop.eup %2822 }
 0x74e   :  { %v1773_v6 = vadd.f32 %v1772_v62, %v1771_v1 }
 0x750   :  { %2824 = vtanh.f32 %v1773_v6 }
 0x75a   :  { %v2825_v8 = vpop.eup %2824 }
 0x75b   :  { %v1775_v9 = vmul.f32 %v2825_v8, %v2823_v7 }
 0x75d   :  { %2276 = vmatmul.mubr.msk.f32.vlgmr.msra.gmra.mrb[14].mxu0 %vm540_vm4, %v1775_v9  ;;  %2277 = vmatmul.mubr.msk.f32.vlgmr.msra.gmra.mrb[14].mxu1 %vm540_vm4, %v1775_v9 }
 0x830   :  { %v1848_v10 = vpop.f32.mrb[14].mxu0  ;;  %v1919_v11 = vpop.f32.mrb[14].mxu1 }
 0x831   :  { %v2278_v12 = vmul.f32 -1.442695, %v1848_v10  ;;  %v1850_v14 = vpop.f32.mrb[15].mxu0  ;;  %v1920_v15 = vpop.f32.mrb[15].mxu1 }
 0x832   :  { %v2279_v16 = vmul.f32 -1.442695, %v1850_v14 }
 0x833   :  { %2826 = vpow2.f32 %v2278_v12 }
 0x834   :  { %2828 = vpow2.f32 %v2279_v16 }
 0x835   :  { %2830 = vtanh.f32 %v1920_v15 }
 0x83d   :  { %v2827_v17 = vpop.eup %2826 }
 0x83e   :  { %v2829_v18 = vpop.eup %2828  ;;  %v1932_v19 = vadd.f32 1.0, %v2827_v17 }
 0x83f   :  { %v1933_v20 = vadd.f32 1.0, %v2829_v18  ;;  %v2831_v21 = vpop.eup %2830 }
 0x840   :  { %2832 = vrcp.f32 %v1932_v19 }
 0x841   :  { %2834 = vrcp.f32 %v1933_v20 }
 0x84a   :  { %v2833_v24 = vpop.eup %2832 }
 0x84b   :  { %v2835_v25 = vpop.eup %2834  ;;  %v1940_v26 = vmul.f32 %v2833_v24, %v2831_v21 }
 0x84c   :  { %v1939_v28 = vmul.f32 %v2835_v25, %v1773_v6 }
 0x84e   :  { %v1941_v29 = vadd.f32 %v1940_v26, %v1939_v28 }
 0x850   :  { %1942 = vst [vmem:[#allocation12] sm:$0xff] %v1941_v29 }
 0x851   :  { %2926 = dma.done.wait [#allocation8], 1024 }
 0x852   :  { %2927 = vsyncadd [#allocation8], 4294966272 }
 0x853   :  { %2928 = dma.done.wait [#allocation8 + $0x1], 16 }
 0x854   :  { %2929 = vsyncadd [#allocation8 + $0x1], 4294967280 }
 0x855   :  { %2930 = dma.done.wait [#allocation8 + $0x2], 2048 }
 0x856   :  { %2931 = vsyncadd [#allocation8 + $0x2], 4294965248 }
 0x857   :  { %2932 = dma.done.wait [#allocation8 + $0x3], 16 }
 0x858   :  { %2933 = vsyncadd [#allocation8 + $0x3], 4294967280 }
 0x859   :  { %2934 = dma.done.wait [#allocation8 + $0x4], 128 }
 0x85a   :  { %2935 = vsyncadd [#allocation8 + $0x4], 4294967168  ;;  %v2945_v30 = vmov 0.0|0.0   ;;  %vm2946_vm5 = vmmov 0   ;;  %v1957_v32 = vld [vmem:[#allocation3] sm:$0xff]  ;;  %v1958_v33 = vld [vmem:[#allocation3 + $0x8] sm:$0xff] }
 0x85b   :  { %2636 = vmatprep.subr.bf16.mxu0 %v2945_v30  ;;  %2330 = vmatprep.mubr.msk.f32.mxu0 %vm2946_vm5, %v2944_v13  ;;  %v1959_v34 = vld [vmem:[#allocation3 + $0x10] sm:$0xff]  ;;  %v2637_v35 = vpack.c.bf16 %v1958_v33, %v1957_v32  ;;  %v1960_v36 = vld [vmem:[#allocation3 + $0x18] sm:$0xff]  ;;  %v2048_v39 = vld [vmem:[#allocation5] sm:$0xff]  ;;  %s2947_s0 = smov [#allocation12]  }
 0x85c   :  { %2648 = vmatprep.subr.bf16.mxu1 %v2945_v30  ;;  %2365 = vmatprep.mubr.msk.f32.mxu1 %vm2946_vm5, %v2944_v13  ;;  %v2640_v40 = vpack.c.bf16 %v1960_v36, %v1959_v34  ;;  %v2049_v41 = vld [vmem:[#allocation5 + $0x8] sm:$0xff]  ;;  %v2050_v43 = vld [vmem:[#allocation5 + $0x10] sm:$0xff]  ;;  %v2051_v44 = vld [vmem:[#allocation5 + $0x18] sm:$0xff]  ;;  %s2150_s26 = sshll.u32 %s2947_s0, 4  ;;  %s2151_s26 = int_to_ptr.vmem [resolvable:$true] %s2150_s26 }
 0x85d   :  { %2638 = vmatpush3.bf16.msra.mxu0 %v2637_v35  ;;  %v1961_v45 = vld [vmem:[#allocation3 + $0x20] sm:$0xff]  ;;  %v1962_v48 = vld [vmem:[#allocation3 + $0x28] sm:$0xff]  ;;  %v2649_v22 = vpack.c.bf16 %v2049_v41, %v2048_v39  ;;  %v2652_v49 = vpack.c.bf16 %v2051_v44, %v2050_v43  ;;  %v1963_v51 = vld [vmem:[#allocation3 + $0x30] sm:$0xff]  ;;  %s2902_s27 = scalar_lea.vmem %s2151_s26, 128  ;;  %p2907_p11 = scmp.lt.s32.totalorder %s2151_s26, %s2151_s26 }
 0x85e   :  { %2639 = vmatprep.subr.bf16.mxu0 %v2945_v30  ;;  %v2643_v31 = vpack.c.bf16 %v1962_v48, %v1961_v45  ;;  %v2052_v13 = vld [vmem:[#allocation5 + $0x20] sm:$0xff]  ;;  %v2053_v50 = vld [vmem:[#allocation5 + $0x28] sm:$0xff]  ;;  %v1964_v52 = vld [vmem:[#allocation3 + $0x38] sm:$0xff]  ;;  %p2903_p10 = scmp.ne.s32.totalorder %s2151_s26, %s2902_s27  ;;  %p2908_p12 = scmp.lt.s32.totalorder %s2902_s27, %s2902_s27 }
 0x85f   :  { %2650 = vmatpush3.bf16.msra.mxu1 %v2649_v22  ;;  %v2655_v54 = vpack.c.bf16 %v2053_v50, %v2052_v13  ;;  %v2646_v55 = vpack.c.bf16 %v1964_v52, %v1963_v51  ;;  %v2054_v58 = vld [vmem:[#allocation5 + $0x30] sm:$0xff]  ;;  %v2055_v59 = vld [vmem:[#allocation5 + $0x38] sm:$0xff]  ;;  %v2056_v23 = vld [vmem:[#allocation5 + $0x40] sm:$0xff] }
 0x860   :  { %2651 = vmatprep.subr.bf16.mxu1 %v2945_v30  ;;  %v2658_v61 = vpack.c.bf16 %v2055_v59, %v2054_v58  ;;  %v2057_v27 = vld [vmem:[#allocation5 + $0x48] sm:$0xff]  ;;  %v2058_v38 = vld [vmem:[#allocation5 + $0x50] sm:$0xff]  ;;  %v2059_v46 = vld [vmem:[#allocation5 + $0x58] sm:$0xff]  ;;  %p2909_p13 = por %p2908_p12, %p2907_p11 }
 0x861   :  { %2641 = vmatpush3.bf16.msra.mxu0 %v2640_v40  ;;  %v2661_v37 = vpack.c.bf16 %v2057_v27, %v2056_v23  ;;  %v2664_v42 = vpack.c.bf16 %v2059_v46, %v2058_v38  ;;  %v2060_v47 = vld [vmem:[#allocation5 + $0x60] sm:$0xff]  ;;  %v2061_v53 = vld [vmem:[#allocation5 + $0x68] sm:$0xff]  ;;  %v2062_v60 = vld [vmem:[#allocation5 + $0x70] sm:$0xff] }
 0x862   :  { %2642 = vmatprep.subr.bf16.mxu0 %v2945_v30  ;;  %v2667_v57 = vpack.c.bf16 %v2061_v53, %v2060_v47  ;;  %v2063_v56 = vld [vmem:[#allocation5 + $0x78] sm:$0xff]  ;;  %p2910_p0 = pnand %p2909_p13, %p2903_p10 }
 0x863   :  { %2653 = vmatpush3.bf16.msra.mxu1 %v2652_v49  ;;  %v2670_v3 = vpack.c.bf16 %v2063_v56, %v2062_v60  ;;  %v2280_v4 = vld [vmem:[#allocation4] ss:$0 sm:$0xff] }
 0x864   :  { %2654 = vmatprep.subr.bf16.mxu1 %v2945_v30 }
 0x865   :  { %2644 = vmatpush3.bf16.msra.mxu0 %v2643_v31 }
 0x866   :  { %2645 = vmatprep.subr.bf16.mxu0 %v2945_v30 }
 0x867   :  { %2656 = vmatpush3.bf16.msra.mxu1 %v2655_v54 }
 0x868   :  { %2657 = vmatprep.subr.bf16.mxu1 %v2945_v30 }
 0x869   :  { %2647 = vmatpush3.bf16.msra.mxu0 %v2646_v55 }
 0x86b   :  { %2659 = vmatpush3.bf16.msra.mxu1 %v2658_v61 }
 0x86c   :  { %2331 = vmatmul.mubr.msk.f32.vlgmr.msra.gmra.mrb[16].mxu0 %vm540_vm4, %v1941_v29  ;;  %2660 = vmatprep.subr.bf16.mxu1 %v2945_v30 }
 0x86f   :  { %2662 = vmatpush3.bf16.msra.mxu1 %v2661_v37 }
 0x870   :  { %2663 = vmatprep.subr.bf16.mxu1 %v2945_v30 }
 0x873   :  { %2665 = vmatpush3.bf16.msra.mxu1 %v2664_v42 }
 0x874   :  { %2666 = vmatprep.subr.bf16.mxu1 %v2945_v30 }
 0x877   :  { %2668 = vmatpush3.bf16.msra.mxu1 %v2667_v57 }
 0x878   :  { %2669 = vmatprep.subr.bf16.mxu1 %v2945_v30 }
 0x87b   :  { %2671 = vmatpush3.bf16.msra.mxu1 %v2670_v3 }
 0x93f   :  { %v2041_v5 = vpop.f32.mrb[16].mxu0 }
 0x940   :  { %v2042_v62 = vadd.f32 %v2280_v4, %v2041_v5  ;;  %v2332_v63 = vpop.f32.mrb[17].mxu0 }
 0x942   :  { %v2045_v0 = vmax.f32 %v2042_v62, 0.0 }
 0x944   :  { %v2047_v1 = vmul.f32 %v2045_v0, %v3043_v2 }
 0x946   :  { %2366 = vmatmul.mubr.f32.vlgmr.msra.gmra.mrb[16].mxu1 %v2047_v1 }
 0x947   :  { %2913 = shalt.err (!%p2910_p0)
}
 0x948   :  { %s2914_s28 = scalar_lea.hbm %s3429_s9, 128 }
 0x949   :  { %p2915_p1 = scmp.ne.s32.totalorder %s3429_s9, %s2914_s28  ;;  %p2918_p2 = scmp.lt.u32.totalorder %s2914_s28, %s3429_s9 }
 0x94b   :  { %p2920_p3 = pnand %p2918_p2, %p2915_p1 }
 0x94d   :  { %2923 = shalt.err (!%p2920_p3)
}
 0x94e   :  { %2153 = dma.vmem_to_hbm [thread:$0]  %s2151_s26, 128, %s3429_s9, [#allocation11]   ;;  %v2282_v2 = vld [vmem:[#allocation6] ss:$0 sm:$0xff] }
 0xa19   :  { %v2137_v6 = vpop.f32.mrb[16].mxu1 }
 0xa1a   :  { %v2138_v7 = vadd.f32 %v2282_v2, %v2137_v6  ;;  %v2367_v8 = vpop.f32.mrb[17].mxu1 }
 0xa1c   :  { %2141 = vst [vmem:[%s3428_s8] sm:$0xff] %v2138_v7 }
 0xa1d   :  { %2936 = dma.done.wait [#allocation11], 128  }
 0xa1e   :  { %2937 = vsyncadd [#allocation11], 4294967168 }
 0xa1f   :  { %2159 = vsyncpa [#allocation10], 1 }
 0xa20   :  { %2160 = vsyncpa [#allocation11], 1 }
 0xa21   :  { %2161 = vsyncmov [#allocation8] }
 0xa24   :  { %s2162_s15 = vpop.sfrf %2161 }
 0xa25   :  { %p2283_p4 = scmp.ne.s32.totalorder %s2162_s15, 0 }
 0xa27   :  { %2166 = shalt.err (%p2283_p4)  }
 0xa28   :  { %2168 = vsyncmov [#allocation8 + $0x1] }
 0xa2b   :  { %s2169_s16 = vpop.sfrf %2168 }
 0xa2c   :  { %p2284_p5 = scmp.ne.s32.totalorder %s2169_s16, 0 }
 0xa2e   :  { %2173 = shalt.err (%p2284_p5)  }
 0xa2f   :  { %2175 = vsyncmov [#allocation8 + $0x2] }
 0xa32   :  { %s2176_s9 = vpop.sfrf %2175 }
 0xa33   :  { %p2285_p6 = scmp.ne.s32.totalorder %s2176_s9, 0 }
 0xa35   :  { %2180 = shalt.err (%p2285_p6)  }
 0xa36   :  { %2182 = vsyncmov [#allocation8 + $0x3] }
 0xa39   :  { %s2183_s17 = vpop.sfrf %2182 }
 0xa3a   :  { %p2286_p7 = scmp.ne.s32.totalorder %s2183_s17, 0 }
 0xa3c   :  { %2187 = shalt.err (%p2286_p7)  }
 0xa3d   :  { %2189 = vsyncmov [#allocation8 + $0x4] }
 0xa40   :  { %s2190_s8 = vpop.sfrf %2189 }
 0xa41   :  { %p2287_p8 = scmp.ne.s32.totalorder %s2190_s8, 0 }
 0xa43   :  { %2194 = shalt.err (%p2287_p8)  }

</bundles_post_ra>
